<compile_context>
chip_gen: v6e
topology: v6e:2x2x1
jax: 0.10.0
libtpu: 0.0.40
codegen_flags: <defaults>
</compile_context>

<pallas_src>
import functools

import jax
import jax.numpy as jnp
from jax.experimental import pallas as pl
from jax.experimental.pallas import tpu as pltpu

_MIN_PALLAS_SEQ = 256  # below this, a fused XLA elementwise op is cheaper


def _round_up(x, m):
    return ((x + m - 1) // m) * m


def _cdiv(a, b):
    return (a + b - 1) // b


def _rotary_kernel(inv_freq_ref, out_ref):
    """Compute one sequence tile of rotary cos/sin embeddings.

    inv_freq_ref : (dim//2, 1) f32 in VMEM (same block every grid step)
    out_ref      : (2, tS, dim) out dtype in VMEM; [0] = cos, [1] = sin

    Compute is lane-dense on the sequence axis ((dim//2, tS) vregs); the flip
    to the HBM layout (tS, dim) happens in-kernel on the XLU so the wrapper
    needs no transpose / extra HBM round trip.
    """
    t_s = out_ref.shape[1]

    # Exact int32 positions for this tile, single convert to f32 (exact <2^24).
    start = pl.program_id(0) * t_s
    pos = (jax.lax.broadcasted_iota(jnp.int32, (1, t_s), 1) + start).astype(
        jnp.float32
    )                                                      # (1, tS)

    # Outer product: (dim//2, 1) * (1, tS) -> (dim//2, tS), f32, lane-dense.
    freqs = inv_freq_ref[...] * pos

    # Transcendentals on the half-width freqs only (torch.cat duplication
    # happens afterwards, so sin/cos work is halved).
    # TODO(synk): a hand-written sincos sharing the range reduction would trim
    # ~30% of the remaining VALU work; jnp.cos/jnp.sin kept for robustness.
    cos_h = jnp.cos(freqs)                                 # (dim//2, tS) f32
    sin_h = jnp.sin(freqs)

    # torch.cat((freqs, freqs), -1) == duplicate along the feature (sublane)
    # axis, then flip to (tS, dim) so the store's last axis matches HBM layout.
    cos_full = jnp.concatenate([cos_h, cos_h], axis=0)     # (dim, tS) f32
    sin_full = jnp.concatenate([sin_h, sin_h], axis=0)
    out_ref[0] = jnp.transpose(cos_full, (1, 0)).astype(out_ref.dtype)
    out_ref[1] = jnp.transpose(sin_full, (1, 0)).astype(out_ref.dtype)


@functools.lru_cache(maxsize=64)
def _build_rotary_call(seq_len, dim, dim_half, t_s, grid, out_dtype_name):
    """Cache the pallas_call callable per (S, dim, tile, dtype)."""
    out_dtype = jnp.dtype(out_dtype_name)
    return pl.pallas_call(
        _rotary_kernel,
        out_shape=jax.ShapeDtypeStruct((2, seq_len, dim), out_dtype),
        grid_spec=pltpu.PrefetchScalarGridSpec(
            num_scalar_prefetch=0,
            grid=(grid,),
            in_specs=[pl.BlockSpec((dim_half, 1), lambda i: (0, 0))],
            # Ragged last block (grid * t_s may exceed S): out-of-bounds writes
            # are masked by Pallas, so no wrapper-side slice/copy is needed.
            out_specs=pl.BlockSpec((2, t_s, dim), lambda i: (0, i, 0)),
        ),
        compiler_params=pltpu.CompilerParams(
            dimension_semantics=("parallel",)
        ),
    )


def _reference(hidden_states, inv_freq):
    """Pure-JAX reference / small-S fallback (matches the PyTorch module)."""
    seq_len = hidden_states.shape[1]
    t = jnp.arange(seq_len, dtype=jnp.float32)
    freqs = jnp.einsum("i,j->ij", t, inv_freq.astype(jnp.float32))
    emb = jnp.concatenate([freqs, freqs], axis=-1)
    cos = jnp.cos(emb)[:, None, None, :]
    sin = jnp.sin(emb)[:, None, None, :]
    return jnp.stack([cos, sin]).astype(hidden_states.dtype)


def rotary_positional_embedding(hidden_states, inv_freq):
    """JAX equivalent of Wav2Vec2ConformerRotaryPositionalEmbedding.forward.

    hidden_states : (B, S, H)  -- only S and dtype are used
    inv_freq      : (dim//2,)  f32 buffer
    returns       : (2, S, 1, 1, dim) with dtype == hidden_states.dtype
    """
    seq_len = hidden_states.shape[1]
    dim_half = inv_freq.shape[0]
    dim = 2 * dim_half
    out_dtype = hidden_states.dtype

    # TODO(synk): the module's Python-side result cache (cached_sequence_length
    # / cached_rotary_positional_embedding) is left to jit / the lru_cache on
    # the compiled callable.
    if seq_len < _MIN_PALLAS_SEQ:
        # pallas_call overhead would dominate the nanoseconds of work here.
        return _reference(hidden_states, inv_freq)

    # Tile choice: multiples of 128 lanes, capped so the (dim, tS) f32
    # intermediates stay ~1 MiB (hard cap 8192 lanes), and always >= 2 tiles so
    # the "parallel" grid axis splits across v7x's two TensorCores.
    seq_pad128 = _round_up(seq_len, 128)
    t_cap = min(8192, max(256, _round_up((256 * 1024) // dim, 128)))
    num_tiles = max(2, _cdiv(seq_pad128, t_cap))
    t_s = _round_up(_cdiv(seq_pad128, num_tiles), 128)
    grid = _cdiv(seq_len, t_s)

    call = _build_rotary_call(seq_len, dim, dim_half, t_s, grid,
                              jnp.dtype(out_dtype).name)
    out = call(inv_freq.reshape(dim_half, 1).astype(jnp.float32))  # (2, S, dim)

    # Adding singleton axes is metadata-only (no HBM copy).
    return out.reshape(2, seq_len, 1, 1, dim)


if __name__ == "__main__":
    base = 10000.0
    key = jax.random.PRNGKey(0)

    # Case 1: module-sized small input (hidden=32, heads=4 -> dim=8, seq=8).
    # Exercises the small-S fallback path.
    hidden_size = 32
    num_attention_heads = 4
    dim = hidden_size // num_attention_heads
    inv_freq = 1.0 / (
        base ** (jnp.arange(0, dim, 2, dtype=jnp.float32) / dim)
    )
    hidden_states = jax.random.normal(key, (2, 8, hidden_size), dtype=jnp.float32)

    out = jax.block_until_ready(rotary_positional_embedding(hidden_states, inv_freq))
    ref = _reference(hidden_states, inv_freq)
    assert out.shape == ref.shape == (2, 8, 1, 1, dim), (out.shape, ref.shape)
    assert out.dtype == hidden_states.dtype
    assert jnp.allclose(out, ref, atol=1e-5, rtol=1e-5)

    # Case 2: Pallas path with a ragged last block and bf16 output.
    # hidden=512, heads=8 -> dim=64, seq=300 (grid=2 tiles of 256).
    hidden_size2 = 512
    num_attention_heads2 = 8
    dim2 = hidden_size2 // num_attention_heads2
    inv_freq2 = 1.0 / (
        base ** (jnp.arange(0, dim2, 2, dtype=jnp.float32) / dim2)
    )
    hidden_states2 = jax.random.normal(
        jax.random.PRNGKey(0), (2, 300, hidden_size2), dtype=jnp.bfloat16
    )

    out2 = jax.block_until_ready(
        rotary_positional_embedding(hidden_states2, inv_freq2)
    )
    ref2 = _reference(hidden_states2, inv_freq2)
    assert out2.shape == ref2.shape == (2, 300, 1, 1, dim2), (out2.shape, ref2.shape)
    assert out2.dtype == hidden_states2.dtype
    assert jnp.allclose(
        out2.astype(jnp.float32), ref2.astype(jnp.float32), atol=2e-2, rtol=2e-2
    )

    # Case 3: Pallas path with exactly divisible tiles and f32 output.
    # hidden=256, heads=4 -> dim=64, seq=512 (grid=2 tiles of 256, no masking).
    hidden_size3 = 256
    num_attention_heads3 = 4
    dim3 = hidden_size3 // num_attention_heads3
    inv_freq3 = 1.0 / (
        base ** (jnp.arange(0, dim3, 2, dtype=jnp.float32) / dim3)
    )
    hidden_states3 = jax.random.normal(
        jax.random.PRNGKey(0), (1, 512, hidden_size3), dtype=jnp.float32
    )

    out3 = jax.block_until_ready(
        rotary_positional_embedding(hidden_states3, inv_freq3)
    )
    ref3 = _reference(hidden_states3, inv_freq3)
    assert out3.shape == ref3.shape == (2, 512, 1, 1, dim3), (out3.shape, ref3.shape)
    assert out3.dtype == hidden_states3.dtype
    assert jnp.allclose(out3, ref3, atol=1e-4, rtol=1e-4)

    print("KERNEL_OK")
</pallas_src>

<mosaic_0001>
module attributes {stable_mosaic.version = 11 : i64} {
  func.func @_rotary_kernel(%arg0: i32, %arg1: memref<32x1xf32, #tpu.memory_space<vmem>>, %arg2: memref<2x256x64xbf16, #tpu.memory_space<vmem>>) attributes {dimension_semantics = [#tpu.dimension_semantics<parallel>], iteration_bounds = array<i64: 2>, scalar_prefetch = 0 : i64, scratch_operands = 0 : i64, tpu.core_type = #tpu.core_type<tc>, window_params = [{pipeline_mode = #tpu.pipeline_mode<synchronous>, transform_indices = @transform_0, window_bounds = array<i64: 32, 1>}, {transform_indices = @transform_1, window_bounds = array<i64: 2, 256, 64>}]} {
    %c256_i32 = arith.constant 256 : i32
    %0 = arith.muli %arg0, %c256_i32 : i32
    %1 = tpu.iota {dimensions = array<i32: 1>} : vector<1x256xi32>
    %2 = vector.broadcast %0 : i32 to vector<1x256xi32>
    %3 = arith.addi %1, %2 : vector<1x256xi32>
    %4 = arith.sitofp %3 : vector<1x256xi32> to vector<1x256xf32>
    %c0 = arith.constant 0 : index
    %c0_0 = arith.constant 0 : index
    %5 = vector.load %arg1[%c0, %c0_0] : memref<32x1xf32, #tpu.memory_space<vmem>>, vector<32x1xf32>
    %6 = vector.broadcast %5 : vector<32x1xf32> to vector<32x256xf32>
    %7 = vector.broadcast %4 : vector<1x256xf32> to vector<32x256xf32>
    %8 = arith.mulf %6, %7 : vector<32x256xf32>
    %9 = math.cos %8 : vector<32x256xf32>
    %10 = math.sin %8 : vector<32x256xf32>
    %11 = tpu.concatenate %9, %9 in 0 : vector<32x256xf32>, vector<32x256xf32> -> vector<64x256xf32>
    %12 = tpu.concatenate %10, %10 in 0 : vector<32x256xf32>, vector<32x256xf32> -> vector<64x256xf32>
    %13 = tpu.transpose %11, [1, 0] : vector<64x256xf32> -> vector<256x64xf32>
    %14 = arith.truncf %13 : vector<256x64xf32> to vector<256x64xbf16>
    %c0_1 = arith.constant 0 : index
    %c0_2 = arith.constant 0 : index
    %c0_3 = arith.constant 0 : index
    %15 = vector.load %arg2[%c0_1, %c0_2, %c0_3] : memref<2x256x64xbf16, #tpu.memory_space<vmem>>, vector<1x256x64xbf16>
    %16 = vector.shape_cast %15 : vector<1x256x64xbf16> to vector<256x64xbf16>
    %17 = vector.shape_cast %14 : vector<256x64xbf16> to vector<1x256x64xbf16>
    tpu.vector_store %arg2[%c0_1, %c0_2, %c0_3], %17 {strides = array<i32>} : memref<2x256x64xbf16, #tpu.memory_space<vmem>>, vector<1x256x64xbf16>,
    %18 = tpu.transpose %12, [1, 0] : vector<64x256xf32> -> vector<256x64xf32>
    %19 = arith.truncf %18 : vector<256x64xf32> to vector<256x64xbf16>
    %c1 = arith.constant 1 : index
    %c0_4 = arith.constant 0 : index
    %c0_5 = arith.constant 0 : index
    %20 = vector.load %arg2[%c1, %c0_4, %c0_5] : memref<2x256x64xbf16, #tpu.memory_space<vmem>>, vector<1x256x64xbf16>
    %21 = vector.shape_cast %20 : vector<1x256x64xbf16> to vector<256x64xbf16>
    %22 = vector.shape_cast %19 : vector<256x64xbf16> to vector<1x256x64xbf16>
    tpu.vector_store %arg2[%c1, %c0_4, %c0_5], %22 {strides = array<i32>} : memref<2x256x64xbf16, #tpu.memory_space<vmem>>, vector<1x256x64xbf16>,
    return
  }
  func.func @transform_0(%arg0: i32) -> (i32, i32) {
    %c0_i32 = arith.constant 0 : i32
    %c0_i32_0 = arith.constant 0 : i32
    %c0_i32_1 = arith.constant 0 : i32
    return %c0_i32, %c0_i32_0 : i32, i32
  }
  func.func @transform_1(%arg0: i32) -> (i32, i32, i32) {
    %c0_i32 = arith.constant 0 : i32
    %c0_i32_0 = arith.constant 0 : i32
    %c0_i32_1 = arith.constant 0 : i32
    return %c0_i32, %arg0, %c0_i32_0 : i32, i32, i32
  }
}

</mosaic_0001>

<bundles_post_ra>
// kernel: tpu_custom_call.1
= control target key start
LH: loop header
LB: loop body
LE: loop exit
PB: predicated region body
PF: predicated region fallthrough
CT: control target
= control target key end

     0   :  { %s3463_s6 = smov 0   ;;  %s3465_s7 = smov 0   ;;  %s4610_s0 = inlined_call_operand.vmem [shape: f32[32,1], index: 0, kind: input, shape index: {}]   ;;  %s4611_s1 = inlined_call_operand.vmem [shape: bf16[2,300,64], index: 1, kind: output, shape index: {}]  }
   0x1   :  { %s3467_s8 = smov 0  }
   0x2 LB: > { %s3476_s9 = sadd.s32 4294967295, %s3412_s8   ;;  %s3478_s10 = sadd.s32 1, %s3412_s8   ;;  %s3412_s8 = sphi %s3467_s8, %s4646_s8   ;;  %s3408_s7 = sphi %s3465_s7, %s4645_s7   ;;  %s3404_s6 = sphi %s3463_s6, %s4644_s6  }
   0x3   : > { %s36_s11 = ssub.s32 %s3412_s8, %s3478_s10  ;;  %s39_s12 = sadd.s32 1, %s3408_s7 }
   0x4   : > { %p37_p0 = scmp.eq.s32.totalorder %s36_s11, 0  ;;  %p49_p1 = scmp.ne.s32.totalorder %s3408_s7, %s3404_s6 }
   0x5   : > { %p50_p2 = scmp.eq.s32.totalorder %s3476_s9, 1  ;;  %p2757_p3 = scmp.ge.s32.totalorder %s3412_s8, 1 }
   0x6   : > { %s3486_s13 = scalar_select %p37_p0, %s3408_s7, %s39_s12  }
   0x7   : > { %p3488_p4 = por %p50_p2, %p49_p1  ;;  %p77_p5 = scmp.lt.s32.totalorder %s3412_s8, 3 }
   0x9   : > { %p78_p6 = pnand %p2757_p3, %p77_p5 }
   0xa   : > { %s2759_s23 = sshll.u32 (!%p78_p6), %s3476_s9, 8  ;;  %s88_s24 = sand.u32 (!%p78_p6), 1, %s3404_s6  }
   0xb   : > { %81 = sbr.rel (%p78_p6) target bundleno = 629 (0x275), region = 24  ;;  %s2758_s25 = sshll.u32 (!%p78_p6), %s88_s24, 8 }
   0xc   : > { %s4277_s26 = scalar_lea.vmem (!%p78_p6), [#allocation2], %s2758_s25  }
  0x10   : > { %v107_v0 = vld [vmem:[%s4610_s0 + $0x10] sm:$0xff]  ;;  %v105_v1 = vld [vmem:[%s4610_s0] sm:$0xff]  ;;  %v3446_v2 = vmov 0   ;;  %v108_v3 = vld [vmem:[%s4610_s0 + $0x18] sm:$0xff]  ;;  %v97_v5 = vlaneseq  ;;  %v100_v8 = vstv %s2759_s23  ;;  %v3447_v46 = vmov 683565275  }
  0x11   : > { %3133 = vset.pattern.permute.xlu1 %v3446_v2  ;;  %3132 = vset.pattern.permute.xlu0 %v3446_v2  ;;  %v106_v4 = vld [vmem:[%s4610_s0 + $0x8] sm:$0xff]  ;;  %v3448_v48 = vmov 2475754826   ;;  %v3449_v50 = vmov 2131351028   ;;  %s2921_s27 = sshll.u32 (%p3488_p4), %s3476_s9, 5 }
  0x12   : > { %121 = vperm.xlu1 %3133, %v107_v0   ;;  %111 = vperm.xlu0 %3132, %v105_v1   ;;  %v98_v6 = vand.u32 127, %v97_v5  ;;  %v3450_v52 = vmov 2102212464   ;;  %v3451_v54 = vmov 920167782   ;;  %s3001_s28 = sshll.u32 (%p3488_p4), %s3476_s9, 7 }
  0x13   : > { %v3452_v62 = vmov 1326507024   ;;  %s2251_s29 = ssub.s32 (%p3488_p4), 38, %s2921_s27  ;;  %s4414_s3 = scalar_lea.vmem (%p3488_p4), %s4611_s1, %s3001_s28  }
  0x14   : > { %v99_v7 = vadd.s32 128, %v98_v6  ;;  %v101_v9 = vadd.s32 %v100_v8, %v98_v6  ;;  %p2252_p7 = scmp.lt.s32.totalorder (%p3488_p4), %s2251_s29, 32 }
  0x16   : > { %126 = vperm.xlu1 %3133, %v108_v3   ;;  %116 = vperm.xlu0 %3132, %v106_v4   ;;  %v102_v10 = vadd.s32 %v100_v8, %v99_v7  ;;  %v3505_v11 = vcvt.s32.f32 %v101_v9 }
  0x18   : > { %v3507_v12 = vcvt.s32.f32 %v102_v10 }
  0x8d   : > { %v122_v13 = vpop.permute.xlu1 %121  ;;  %v112_v14 = vpop.permute.xlu0 %111 }
  0x8e   : > { %v3510_v15 = vmul.f32 %v122_v13, %v3505_v11  ;;  %v3513_v16 = vmul.f32 %v122_v13, %v3507_v12  ;;  %v3516_v17 = vmul.f32 %v112_v14, %v3505_v11  ;;  %v3528_v34 = vmul.f32 %v112_v14, %v3507_v12 }
  0x90   : > { %v4614_v18 = vand.u32 2147483647, %v3510_v15  ;;  %v552_v19 = vand.u32 2139095040, %v3510_v15  ;;  %v4613_v20 = vand.u32 2147483647, %v3513_v16  ;;  %v655_v21 = vand.u32 2139095040, %v3513_v16 }
  0x91   : > { %v140_v23 = vand.u32 2139095040, %v3516_v17  ;;  %v137_v40 = vand.u32 2147483647, %v3516_v17  ;;  %v243_v44 = vand.u32 2139095040, %v3528_v34 }
  0x92   : > { %v553_v22 = vshrl.u32 %v552_v19, 23  ;;  %v556_v24 = vand.u32 8388607, %v4614_v18  ;;  %v656_v25 = vshrl.u32 %v655_v21, 23  ;;  %v659_v26 = vand.u32 8388607, %v4613_v20 }
  0x93   : > { %v141_v29 = vshrl.u32 %v140_v23, 23 }
  0x94   : > { %v2776_v27 = vadd.s32 4294967169, %v553_v22  ;;  %v2780_v28 = vadd.s32 4294967169, %v656_v25  ;;  %v557_v31 = vor.u32 8388608, %v556_v24  ;;  %v660_v32 = vor.u32 8388608, %v659_v26 }
  0x95   : > { %v2760_v36 = vadd.s32 4294967169, %v141_v29 }
  0x96   : > { %v559_v30 = vadd.s32 1, %v2776_v27  ;;  %v662_v33 = vadd.s32 1, %v2780_v28  ;;  %v3531_v41 = vshll.u32 %v557_v31, 8  ;;  %v3533_v43 = vshll.u32 %v660_v32, 8 }
  0x97   : > { %v3541_v56 = vadd.s32 1, %v2760_v36 }
  0x98   : > { %vm560_vm0 = vcmp.gt.s32.totalorder %v559_v30, 0  ;;  %vm663_vm1 = vcmp.gt.s32.totalorder %v662_v33, 0 }
  0x99   : > { %v561_v35 = vsel %vm560_vm0, %v559_v30, 0  ;;  %v664_v39 = vsel %vm663_vm1, %v662_v33, 0  ;;  %vm148_vm6 = vcmp.gt.s32.totalorder %v3541_v56, 0 }
  0x9a   : > { %v562_v37 = vshrl.u32 %v561_v35, 5  ;;  %v563_v38 = vand.u32 31, %v561_v35  ;;  %v666_v42 = vand.u32 31, %v664_v39  ;;  %v665_v24 = vshrl.u32 %v664_v39, 5 }
  0x9c   : > { %v564_v45 = vsub.s32 32, %v563_v38  ;;  %v566_v47 = vshll.u32 %v3447_v46, %v563_v38  ;;  %v569_v49 = vshll.u32 %v3448_v48, %v563_v38  ;;  %v572_v51 = vshll.u32 %v3449_v50, %v563_v38 }
  0x9d   : > { %v575_v53 = vshll.u32 %v3450_v52, %v563_v38  ;;  %v578_v55 = vshll.u32 %v3451_v54, %v563_v38  ;;  %vm581_vm2 = vcmp.lt.s32.totalorder %v562_v37, 1  ;;  %vm583_vm3 = vcmp.lt.s32.totalorder %v562_v37, 3 }
  0x9e   : > { %v565_v57 = vshrl.u32 %v3447_v46, %v564_v45  ;;  %v567_v58 = vshrl.u32 %v3448_v48, %v564_v45  ;;  %v570_v59 = vshrl.u32 %v3449_v50, %v564_v45  ;;  %v573_v60 = vshrl.u32 %v3450_v52, %v564_v45 }
  0x9f   : > { %v576_v61 = vshrl.u32 %v3451_v54, %v564_v45  ;;  %v579_v63 = vshrl.u32 %v3452_v62, %v564_v45  ;;  %vm584_vm4 = vcmp.lt.s32.totalorder %v562_v37, 4  ;;  %v667_v3 = vsub.s32 32, %v666_v42 }
  0xa0   : > { %v568_v0 = vor.u32 %v567_v58, %v566_v47  ;;  %v571_v1 = vor.u32 %v570_v59, %v569_v49  ;;  %v574_v2 = vor.u32 %v573_v60, %v572_v51  ;;  %vm582_vm5 = vcmp.lt.s32.totalorder %v562_v37, 2 }
  0xa1   : > { %v577_v4 = vor.u32 %v576_v61, %v575_v53  ;;  %v580_v5 = vor.u32 %v579_v63, %v578_v55  ;;  %v669_v6 = vshll.u32 %v3447_v46, %v666_v42  ;;  %v672_v21 = vshll.u32 %v3448_v48, %v666_v42 }
  0xa2   : > { %v585_v7 = vsel %vm581_vm2, %v565_v57, %v568_v0  ;;  %v586_v8 = vsel %vm584_vm4, %v574_v2, 2102212464  ;;  %v589_v9 = vsel %vm581_vm2, %v568_v0, %v571_v1  ;;  %v593_v10 = vsel %vm581_vm2, %v571_v1, %v574_v2 }
  0xa3   : > { %v587_v13 = vsel %vm583_vm3, %v571_v1, %v586_v8  ;;  %v590_v14 = vsel %vm584_vm4, %v577_v4, 920167782  ;;  %v594_v19 = vsel %vm584_vm4, %v580_v5, 1326507024  ;;  %v670_v25 = vshrl.u32 %v3448_v48, %v667_v3 }
  0xa4   : > { %v591_v22 = vsel %vm583_vm3, %v574_v2, %v590_v14  ;;  %v595_v23 = vsel %vm583_vm3, %v577_v4, %v594_v19  ;;  %v588_v26 = vsel %vm582_vm5, %v585_v7, %v587_v13  ;;  %v673_v29 = vshrl.u32 %v3449_v50, %v667_v3 }
  0xa5   : > { %v592_v27 = vsel %vm582_vm5, %v589_v9, %v591_v22  ;;  %v596_v28 = vsel %vm582_vm5, %v593_v10, %v595_v23  ;;  %v671_v35 = vor.u32 %v670_v25, %v669_v6  ;;  %v675_v38 = vshll.u32 %v3449_v50, %v666_v42 }
  0xa6   : > { %v3567_v30 = vmul.u32.u64.low %v3531_v41, %v596_v28  ;;  %v3568_v31 = vmul.u32.u64.high %v3531_v41, %v596_v28, %v3567_v30  ;;  %v3571_v32 = vmul.u32.u64.low %v3531_v41, %v592_v27  ;;  %v3572_v33 = vmul.u32.u64.high %v3531_v41, %v592_v27, %v3571_v32 }
  0xa7   : > { %v674_v36 = vor.u32 %v673_v29, %v672_v21  ;;  %v676_v39 = vshrl.u32 %v3450_v52, %v667_v3  ;;  %v678_v37 = vshll.u32 %v3450_v52, %v666_v42  ;;  %v679_v45 = vshrl.u32 %v3451_v54, %v667_v3 }
  0xa8   : > { %v681_v47 = vshll.u32 %v3451_v54, %v666_v42  ;;  %v682_v49 = vshrl.u32 %v3452_v62, %v667_v3  ;;  %v604_v51 = vmul.u32 %v3531_v41, %v588_v26  ;;  %v668_v53 = vshrl.u32 %v3447_v46, %v667_v3 }
  0xa9   : > { %v677_v55 = vor.u32 %v676_v39, %v675_v38  ;;  %vm684_vm7 = vcmp.lt.s32.totalorder %v665_v24, 1  ;;  %vm606_vm8 = vc.u32 %v3568_v31, %v3571_v32  ;;  %v607_v57 = vadd.s32 1, %v3572_v33 }
  0xaa   : > { %v680_v58 = vor.u32 %v679_v45, %v678_v37  ;;  %vm686_vm9 = vcmp.lt.s32.totalorder %v665_v24, 3  ;;  %v683_v59 = vor.u32 %v682_v49, %v681_v47  ;;  %vm685_vm10 = vcmp.lt.s32.totalorder %v665_v24, 2 }
  0xab   : > { %vm687_vm11 = vcmp.lt.s32.totalorder %v665_v24, 4  ;;  %v692_v42 = vsel %vm684_vm7, %v671_v35, %v674_v36  ;;  %v608_v60 = vsel %vm606_vm8, %v607_v57, %v3572_v33  ;;  %v696_v63 = vsel %vm684_vm7, %v674_v36, %v677_v55 }
  0xac   : > { %v689_v61 = vsel %vm687_vm11, %v677_v55, 2102212464  ;;  %v693_v41 = vsel %vm687_vm11, %v680_v58, 920167782  ;;  %v609_v0 = vadd.s32 %v608_v60, %v604_v51  ;;  %v697_v2 = vsel %vm687_vm11, %v683_v59, 1326507024 }
  0xad   : > { %v694_v1 = vsel %vm686_vm9, %v677_v55, %v693_v41  ;;  %v149_v3 = vsel %vm148_vm6, %v3541_v56, 0  ;;  %v688_v4 = vsel %vm684_vm7, %v668_v53, %v671_v35  ;;  %v690_v5 = vsel %vm686_vm9, %v674_v36, %v689_v61 }
  0xae   : > { %v695_v6 = vsel %vm685_vm10, %v692_v42, %v694_v1  ;;  %v698_v7 = vsel %vm686_vm9, %v680_v58, %v697_v2  ;;  %v610_v8 = vadd.s32 536870912, %v609_v0  ;;  %v151_v56 = vand.u32 31, %v149_v3 }
  0xaf   : > { %v699_v9 = vsel %vm685_vm10, %v696_v63, %v698_v7  ;;  %v3599_v10 = vmul.u32.u64.low %v3533_v43, %v695_v6  ;;  %v3600_v13 = vmul.u32.u64.high %v3533_v43, %v695_v6, %v3599_v10  ;;  %v691_v22 = vsel %vm685_vm10, %v688_v4, %v690_v5 }
  0xb0   : > { %v3604_v14 = vmul.u32.u64.low %v3533_v43, %v699_v9  ;;  %v3605_v19 = vmul.u32.u64.high %v3533_v43, %v699_v9, %v3604_v14  ;;  %v3607_v21 = vshrl.u32 %v610_v8, 30  ;;  %v144_v23 = vand.u32 8388607, %v137_v40 }
  0xb1   : > { %v152_v25 = vsub.s32 32, %v151_v56  ;;  %v710_v27 = vadd.s32 1, %v3600_v13  ;;  %v150_v28 = vshrl.u32 %v149_v3, 5  ;;  %v244_v29 = vshrl.u32 %v243_v44, 23 }
  0xb2   : > { %v612_v26 = vshll.u32 %v3607_v21, 30  ;;  %v707_v30 = vmul.u32 %v3533_v43, %v691_v22  ;;  %vm709_vm12 = vc.u32 %v3605_v19, %v3599_v10  ;;  %v154_v24 = vshll.u32 %v3447_v46, %v151_v56 }
  0xb3   : > { %v155_v33 = vshrl.u32 %v3448_v48, %v152_v25  ;;  %v711_v36 = vsel %vm709_vm12, %v710_v27, %v3600_v13  ;;  %v157_v38 = vshll.u32 %v3448_v48, %v151_v56  ;;  %v158_v39 = vshrl.u32 %v3449_v50, %v152_v25 }
  0xb4   : > { %v3621_v35 = vsub.s32 %v609_v0, %v612_v26  ;;  %v712_v37 = vadd.s32 %v711_v36, %v707_v30  ;;  %v160_v44 = vshll.u32 %v3449_v50, %v151_v56  ;;  %v161_v43 = vshrl.u32 %v3450_v52, %v152_v25 }
  0xb5   : > { %v163_v45 = vshll.u32 %v3450_v52, %v151_v56  ;;  %v156_v49 = vor.u32 %v155_v33, %v154_v24  ;;  %v159_v51 = vor.u32 %v158_v39, %v157_v38  ;;  %v164_v53 = vshrl.u32 %v3451_v54, %v152_v25 }
  0xb6   : > { %v615_v47 = vsub.s32 0, %v3621_v35  ;;  %v713_v55 = vadd.s32 536870912, %v712_v37  ;;  %v162_v57 = vor.u32 %v161_v43, %v160_v44  ;;  %v166_v58 = vshll.u32 %v3451_v54, %v151_v56 }
  0xb7   : > { %v167_v59 = vshrl.u32 %v3452_v62, %v152_v25  ;;  %v145_v42 = vor.u32 8388608, %v144_v23  ;;  %v165_v60 = vor.u32 %v164_v53, %v163_v45  ;;  %vm172_vm13 = vcmp.lt.s32.totalorder %v150_v28, 4 }
  0xb8   : > { %v3633_v61 = vshrl.u32 %v713_v55, 30  ;;  %v2764_v63 = vadd.s32 4294967169, %v244_v29  ;;  %vm169_vm14 = vcmp.lt.s32.totalorder %v150_v28, 1  ;;  %vm171_vm15 = vcmp.lt.s32.totalorder %v150_v28, 3 }
  0xb9   : > { %v168_v41 = vor.u32 %v167_v59, %v166_v58  ;;  %v178_v0 = vsel %vm172_vm13, %v165_v60, 920167782  ;;  %v2777_v1 = vmin.u32 %v615_v47, %v3621_v35  ;;  %v177_v2 = vsel %vm169_vm14, %v156_v49, %v159_v51 }
  0xba   : > { %v179_v3 = vsel %vm171_vm15, %v162_v57, %v178_v0  ;;  %v181_v4 = vsel %vm169_vm14, %v159_v51, %v162_v57  ;;  %v715_v5 = vshll.u32 %v3633_v61, 30  ;;  %v185_v7 = vshll.u32 %v145_v42, 8 }
  0xbb   : > { %v182_v6 = vsel %vm172_vm13, %v168_v41, 1326507024  ;;  %vm170_vm0 = vcmp.lt.s32.totalorder %v150_v28, 2  ;;  %v174_v8 = vsel %vm172_vm13, %v162_v57, 2102212464  ;;  %v250_v13 = vadd.s32 1, %v2764_v63 }
  0xbc   : > { %v183_v9 = vsel %vm171_vm15, %v165_v60, %v182_v6  ;;  %v153_v14 = vshrl.u32 %v3447_v46, %v152_v25  ;;  %v180_v56 = vsel %vm170_vm0, %v177_v2, %v179_v3  ;;  %v617_v23 = vclz %v2777_v1 }
  0xbd   : > { %v184_v22 = vsel %vm170_vm0, %v181_v4, %v183_v9  ;;  %v3647_v29 = vsub.s32 %v712_v37, %v715_v5  ;;  %v175_v24 = vsel %vm171_vm15, %v159_v51, %v174_v8  ;;  %vm251_vm1 = vcmp.gt.s32.totalorder %v250_v13, 0  ;;  %v127_v8 = vpop.permute.xlu1 %126 }
  0xbe   : > { %v3644_v26 = vmul.u32.u64.low %v185_v7, %v184_v22  ;;  %v3645_v27 = vmul.u32.u64.high %v185_v7, %v184_v22, %v3644_v26  ;;  %v173_v30 = vsel %vm169_vm14, %v153_v14, %v156_v49  ;;  %v252_v25 = vsel %vm251_vm1, %v250_v13, 0 }
  0xbf   : > { %v3651_v33 = vmul.u32.u64.low %v185_v7, %v180_v56  ;;  %v3652_v36 = vmul.u32.u64.high %v185_v7, %v180_v56, %v3651_v33  ;;  %v4615_v38 = vand.u32 2147483647, %v3528_v34  ;;  %v254_v39 = vand.u32 31, %v252_v25 }
  0xc0   : > { %v2778_v44 = vadd.s32 4294967294, %v617_v23  ;;  %v176_v43 = vsel %vm170_vm0, %v173_v30, %v175_v24  ;;  %v718_v45 = vsub.s32 0, %v3647_v29  ;;  %v253_v63 = vshrl.u32 %v252_v25, 5 }
  0xc1   : > { %vm194_vm2 = vc.u32 %v3645_v27, %v3651_v33  ;;  %v195_v37 = vadd.s32 1, %v3652_v36  ;;  %v255_v47 = vsub.s32 32, %v254_v39  ;;  %v192_v49 = vmul.u32 %v185_v7, %v176_v43 }
  0xc2   : > { %v247_v51 = vand.u32 8388607, %v4615_v38  ;;  %vm2779_vm3 = vcmp.lt.s32.totalorder %v2778_v44, 0  ;;  %v2781_v55 = vmin.u32 %v718_v45, %v3647_v29  ;;  %v257_v0 = vshll.u32 %v3447_v46, %v254_v39 }
  0xc3   : > { %v196_v53 = vsel %vm194_vm2, %v195_v37, %v3652_v36  ;;  %v258_v28 = vshrl.u32 %v3448_v48, %v255_v47  ;;  %v261_v58 = vshrl.u32 %v3449_v50, %v255_v47  ;;  %v264_v59 = vshrl.u32 %v3450_v52, %v255_v47 }
  0xc4   : > { %v197_v57 = vadd.s32 %v196_v53, %v192_v49  ;;  %v3668_v42 = vsel %vm2779_vm3, 0, %v2778_v44  ;;  %v248_v41 = vor.u32 8388608, %v247_v51  ;;  %v260_v1 = vshll.u32 %v3448_v48, %v254_v39 }
  0xc5   : > { %v263_v2 = vshll.u32 %v3449_v50, %v254_v39  ;;  %v267_v3 = vshrl.u32 %v3451_v54, %v255_v47  ;;  %v720_v4 = vclz %v2781_v55  ;;  %v266_v6 = vshll.u32 %v3450_v52, %v254_v39 }
  0xc6   : > { %v198_v60 = vadd.s32 536870912, %v197_v57  ;;  %v270_v7 = vshrl.u32 %v3452_v62, %v255_v47  ;;  %v259_v9 = vor.u32 %v258_v28, %v257_v0  ;;  %v262_v13 = vor.u32 %v261_v58, %v260_v1 }
  0xc7   : > { %v265_v14 = vor.u32 %v264_v59, %v263_v2  ;;  %v269_v56 = vshll.u32 %v3451_v54, %v254_v39  ;;  %v268_v23 = vor.u32 %v267_v3, %v266_v6  ;;  %v288_v30 = vshll.u32 %v248_v41, 8 }
  0xc8   : > { %v3674_v5 = vshrl.u32 %v198_v60, 30  ;;  %v3681_v24 = vmul.f32 %v127_v8, %v3505_v11  ;;  %v625_v36 = vsub.s32 4294967266, %v3668_v42  ;;  %vm272_vm4 = vcmp.lt.s32.totalorder %v253_v63, 1 }
  0xc9   : > { %v271_v26 = vor.u32 %v270_v7, %v269_v56  ;;  %vm275_vm5 = vcmp.lt.s32.totalorder %v253_v63, 4  ;;  %v2782_v44 = vadd.s32 4294967294, %v720_v4  ;;  %v256_v43 = vshrl.u32 %v3447_v46, %v255_v47 }
  0xca   : > { %v200_v22 = vshll.u32 %v3674_v5, 30  ;;  %v277_v45 = vsel %vm275_vm5, %v265_v14, 2102212464  ;;  %v280_v37 = vsel %vm272_vm4, %v259_v9, %v262_v13  ;;  %vm274_vm6 = vcmp.lt.s32.totalorder %v253_v63, 3 }
  0xcb   : > { %v281_v49 = vsel %vm275_vm5, %v268_v23, 920167782  ;;  %v284_v51 = vsel %vm272_vm4, %v262_v13, %v265_v14  ;;  %vm273_vm7 = vcmp.lt.s32.totalorder %v253_v63, 2  ;;  %v276_v53 = vsel %vm272_vm4, %v256_v43, %v259_v9 }
  0xcc   : > { %v3684_v25 = vsub.s32 %v197_v57, %v200_v22  ;;  %v282_v55 = vsel %vm274_vm6, %v265_v14, %v281_v49  ;;  %v285_v28 = vsel %vm275_vm5, %v271_v26, 1326507024  ;;  %v278_v57 = vsel %vm274_vm6, %v262_v13, %v277_v45 }
  0xcd   : > { %v283_v59 = vsel %vm273_vm7, %v280_v37, %v282_v55  ;;  %v286_v60 = vsel %vm274_vm6, %v268_v23, %v285_v28  ;;  %v621_v41 = vsub.s32 32, %v3668_v42  ;;  %vm2783_vm8 = vcmp.lt.s32.totalorder %v2782_v44, 0 }
  0xce   : > { %v203_v39 = vsub.s32 0, %v3684_v25  ;;  %v287_v0 = vsel %vm273_vm7, %v284_v51, %v286_v60  ;;  %v3690_v47 = vmul.u32.u64.low %v288_v30, %v283_v59  ;;  %v3691_v1 = vmul.u32.u64.high %v288_v30, %v283_v59, %v3690_v47 }
  0xcf   : > { %v3694_v3 = vmul.u32.u64.low %v288_v30, %v287_v0  ;;  %v3695_v4 = vmul.u32.u64.high %v288_v30, %v287_v0, %v3694_v3  ;;  %v605_v63 = vadd.s32 %v3571_v32, %v3568_v31  ;;  %v279_v6 = vsel %vm273_vm7, %v276_v53, %v278_v57 }
  0xd0   : > { %v2761_v58 = vmin.u32 %v203_v39, %v3684_v25  ;;  %v758_v7 = vand.u32 2139095040, %v3681_v24  ;;  %v626_v9 = vadd.s32 127, %v625_v36  ;;  %v3700_v56 = vsel %vm2783_vm8, 0, %v2782_v44 }
  0xd1   : > { %v623_v14 = vshrl.u32 %v605_v63, %v621_v41  ;;  %v298_v22 = vadd.s32 1, %v3691_v1  ;;  %v295_v26 = vmul.u32 %v288_v30, %v279_v6  ;;  %vm297_vm10 = vc.u32 %v3695_v4, %v3690_v47 }
  0xd2   : > { %v205_v2 = vclz %v2761_v58  ;;  %v759_v23 = vshrl.u32 %v758_v7, 23  ;;  %v4612_v43 = vand.u32 2147483647, %v3681_v24  ;;  %v622_v31 = vshll.u32 %v3621_v35, %v3668_v42 }
  0xd3   : > { %v299_v32 = vsel %vm297_vm10, %v298_v22, %v3691_v1  ;;  %v627_v45 = vshll.u32 %v626_v9, 23  ;;  %v728_v49 = vsub.s32 4294967266, %v3700_v56  ;;  %v3715_v53 = vmul.f32 %v127_v8, %v3507_v12 }
  0xd4   : > { %v2762_v13 = vadd.s32 4294967294, %v205_v2  ;;  %v2784_v36 = vadd.s32 4294967169, %v759_v23  ;;  %v300_v44 = vadd.s32 %v299_v32, %v295_v26  ;;  %v3711_v39 = vor.u32 %v623_v14, %v622_v31 }
  0xd5   : > { %v762_v55 = vand.u32 8388607, %v4612_v43  ;;  %v3721_v35 = vadd.s32 %v3599_v10, %v3605_v19  ;;  %v3724_v28 = vor.u32 4788187, %v627_v45  ;;  %v193_v58 = vadd.s32 %v3651_v33, %v3645_v27 }
  0xd6   : > { %vm2763_vm9 = vcmp.lt.s32.totalorder %v2762_v13, 0  ;;  %v765_v30 = vadd.s32 1, %v2784_v36  ;;  %v301_v51 = vadd.s32 536870912, %v300_v44  ;;  %v631_v8 = vcvt.s32.f32 %v3711_v39 }
  0xd7   : > { %v3709_v37 = vsel %vm2763_vm9, 0, %v2762_v13  ;;  %v724_v60 = vsub.s32 32, %v3700_v56  ;;  %v3732_v41 = vadd.s32 127, %v728_v49  ;;  %v763_v19 = vor.u32 8388608, %v762_v55 }
  0xd8   : > { %v213_v42 = vsub.s32 4294967266, %v3709_v37  ;;  %vm766_vm11 = vcmp.gt.s32.totalorder %v765_v30, 0  ;;  %v3728_v57 = vshrl.u32 %v301_v51, 30  ;;  %v4616_v1 = vand.u32 2147483647, %v3715_v53 }
  0xd9   : > { %v767_v59 = vsel %vm766_vm11, %v765_v30, 0  ;;  %v861_v2 = vand.u32 2139095040, %v3715_v53  ;;  %v209_v31 = vsub.s32 32, %v3709_v37  ;;  %v3751_v30 = vshll.u32 %v763_v19, 8 }
  0xda   : > { %v769_v0 = vand.u32 31, %v767_v59  ;;  %v303_v10 = vshll.u32 %v3728_v57, 30  ;;  %v214_v3 = vadd.s32 127, %v213_v42  ;;  %v768_v7 = vshrl.u32 %v767_v59, 5 }
  0xdb   : > { %v862_v51 = vshrl.u32 %v861_v2, 23  ;;  %v210_v55 = vshll.u32 %v3684_v25, %v3709_v37  ;;  %v211_v18 = vshrl.u32 %v193_v58, %v209_v31  ;;  %vm139_vm3 = vcmp.lt.s32.totalorder %v3516_v17, 0 }
  0xdc   : > { %v770_v63 = vsub.s32 32, %v769_v0  ;;  %v772_v27 = vshll.u32 %v3447_v46, %v769_v0  ;;  %v775_v33 = vshll.u32 %v3448_v48, %v769_v0  ;;  %v3739_v6 = vsub.s32 %v300_v44, %v303_v10 }
  0xdd   : > { %v778_v9 = vshll.u32 %v3449_v50, %v769_v0  ;;  %v781_v13 = vshll.u32 %v3450_v52, %v769_v0  ;;  %v784_v26 = vshll.u32 %v3451_v54, %v769_v0  ;;  %v215_v10 = vshll.u32 %v214_v3, 23 }
  0xde   : > { %v773_v14 = vshrl.u32 %v3448_v48, %v770_v63  ;;  %v776_v22 = vshrl.u32 %v3449_v50, %v770_v63  ;;  %v779_v23 = vshrl.u32 %v3450_v52, %v770_v63  ;;  %v306_v32 = vsub.s32 0, %v3739_v6 }
  0xdf   : > { %v782_v36 = vshrl.u32 %v3451_v54, %v770_v63  ;;  %v785_v45 = vshrl.u32 %v3452_v62, %v770_v63  ;;  %v771_v43 = vshrl.u32 %v3447_v46, %v770_v63  ;;  %vm787_vm12 = vcmp.lt.s32.totalorder %v768_v7, 1 }
  0xe0   : > { %v774_v44 = vor.u32 %v773_v14, %v772_v27  ;;  %v777_v49 = vor.u32 %v776_v22, %v775_v33  ;;  %v2765_v42 = vmin.u32 %v306_v32, %v3739_v6  ;;  %v780_v59 = vor.u32 %v779_v23, %v778_v9 }
  0xe1   : > { %v783_v0 = vor.u32 %v782_v36, %v781_v13  ;;  %v786_v20 = vor.u32 %v785_v45, %v784_v26  ;;  %vm790_vm13 = vcmp.lt.s32.totalorder %v768_v7, 4  ;;  %vm788_vm14 = vcmp.lt.s32.totalorder %v768_v7, 2 }
  0xe2   : > { %v308_v38 = vclz %v2765_v42  ;;  %v795_v27 = vsel %vm787_vm12, %v774_v44, %v777_v49  ;;  %vm789_vm15 = vcmp.lt.s32.totalorder %v768_v7, 3  ;;  %v2788_v2 = vadd.s32 4294967169, %v862_v51 }
  0xe3   : > { %v796_v19 = vsel %vm790_vm13, %v783_v0, 920167782  ;;  %v792_v14 = vsel %vm790_vm13, %v780_v59, 2102212464  ;;  %v799_v37 = vsel %vm787_vm12, %v777_v49, %v780_v59  ;;  %v216_v22 = vor.u32 4788187, %v215_v10 }
  0xe4   : > { %v2766_v33 = vadd.s32 4294967294, %v308_v38  ;;  %v797_v25 = vsel %vm789_vm15, %v780_v59, %v796_v19  ;;  %v791_v9 = vsel %vm787_vm12, %v771_v43, %v774_v44  ;;  %v800_v13 = vsel %vm790_vm13, %v786_v20, 1326507024 }
  0xe5   : > { %v798_v3 = vsel %vm788_vm14, %v795_v27, %v797_v25  ;;  %v801_v63 = vsel %vm789_vm15, %v783_v0, %v800_v13  ;;  %v793_v31 = vsel %vm789_vm15, %v777_v49, %v792_v14  ;;  %v868_v32 = vadd.s32 1, %v2788_v2  ;;  %v117_v49 = vpop.permute.xlu0 %116 }
  0xe6   : > { %vm2767_vm0 = vcmp.lt.s32.totalorder %v2766_v33, 0  ;;  %v3759_v58 = vmul.u32.u64.low %v3751_v30, %v798_v3  ;;  %v3760_v23 = vmul.u32.u64.high %v3751_v30, %v798_v3, %v3759_v58  ;;  %v802_v38 = vsel %vm788_vm14, %v799_v37, %v801_v63 }
  0xe7   : > { %v3763_v26 = vsel %vm2767_vm0, 0, %v2766_v33  ;;  %v629_v36 = vand.u32 2147483647, %v3724_v28  ;;  %v212_v45 = vor.u32 %v211_v18, %v210_v55  ;;  %v865_v20 = vand.u32 8388607, %v4616_v1 }
  0xe8   : > { %v316_v43 = vsub.s32 4294967266, %v3763_v26  ;;  %v725_v44 = vshll.u32 %v3647_v29, %v3700_v56  ;;  %v3773_v51 = vmul.u32.u64.low %v3751_v30, %v802_v38  ;;  %v3774_v42 = vmul.u32.u64.high %v3751_v30, %v802_v38, %v3773_v51 }
  0xe9   : > { %vm869_vm1 = vcmp.gt.s32.totalorder %v868_v32, 0  ;;  %v217_v59 = vand.u32 2147483647, %v216_v22  ;;  %v794_v0 = vsel %vm788_vm14, %v791_v9, %v793_v31  ;;  %v813_v10 = vadd.s32 1, %v3760_v23 }
  0xea   : > { %v870_v18 = vsel %vm869_vm1, %v868_v32, 0  ;;  %v3781_v55 = vshrl.u32 %v3721_v35, %v724_v60  ;;  %v730_v27 = vshll.u32 %v3732_v41, 23  ;;  %v296_v19 = vadd.s32 %v3690_v47, %v3695_v4 }
  0xeb   : > { %v872_v2 = vand.u32 31, %v870_v18  ;;  %v219_v33 = vcvt.s32.f32 %v212_v45  ;;  %v317_v14 = vadd.s32 127, %v316_v43  ;;  %v866_v25 = vor.u32 8388608, %v865_v20 }
  0xec   : > { %v3787_v7 = vmul.f32 %v117_v49, %v3505_v11  ;;  %v810_v37 = vmul.u32 %v3751_v30, %v794_v0  ;;  %vm812_vm2 = vc.u32 %v3774_v42, %v3759_v58  ;;  %v3793_v35 = vmul.f32 %v117_v49, %v3507_v12 }
  0xed   : > { %v873_v22 = vsub.s32 32, %v872_v2  ;;  %v220_v60 = vmul.f32 %v219_v33, %v217_v59  ;;  %v814_v9 = vsel %vm812_vm2, %v813_v10, %v3760_v23  ;;  %v875_v47 = vshll.u32 %v3447_v46, %v872_v2 }
  0xee   : > { %v878_v4 = vshll.u32 %v3448_v48, %v872_v2  ;;  %v312_v3 = vsub.s32 32, %v3763_v26  ;;  %v815_v11 = vadd.s32 %v814_v9, %v810_v37  ;;  %v318_v63 = vshll.u32 %v317_v14, 23 }
  0xef   : > { %v876_v13 = vshrl.u32 %v3448_v48, %v873_v22  ;;  %v879_v30 = vshrl.u32 %v3449_v50, %v873_v22  ;;  %v881_v31 = vshll.u32 %v3449_v50, %v872_v2  ;;  %v882_v12 = vshrl.u32 %v3450_v52, %v873_v22 }
  0xf0   : > { %v884_v38 = vshll.u32 %v3450_v52, %v872_v2  ;;  %v816_v32 = vadd.s32 536870912, %v815_v11  ;;  %v871_v23 = vshrl.u32 %v870_v18, 5  ;;  %v885_v45 = vshrl.u32 %v3451_v54, %v873_v22 }
  0xf1   : > { %v346_v43 = vand.u32 2139095040, %v3787_v7  ;;  %v877_v20 = vor.u32 %v876_v13, %v875_v47  ;;  %v880_v51 = vor.u32 %v879_v30, %v878_v4  ;;  %v887_v49 = vshll.u32 %v3451_v54, %v872_v2 }
  0xf2   : > { %v888_v59 = vshrl.u32 %v3452_v62, %v873_v22  ;;  %v314_v0 = vshrl.u32 %v296_v19, %v312_v3  ;;  %v3809_v10 = vshrl.u32 %v816_v32, 30  ;;  %v883_v33 = vor.u32 %v882_v12, %v881_v31 }
  0xf3   : > { %v886_v14 = vor.u32 %v885_v45, %v884_v38  ;;  %v313_v18 = vshll.u32 %v3739_v6, %v3763_v26  ;;  %v319_v37 = vor.u32 4788187, %v318_v63  ;;  %v874_v9 = vshrl.u32 %v3447_v46, %v873_v22 }
  0xf4   : > { %v906_v1 = vshll.u32 %v866_v25, 8  ;;  %v818_v47 = vshll.u32 %v3809_v10, 30  ;;  %v889_v4 = vor.u32 %v888_v59, %v887_v49  ;;  %vm890_vm4 = vcmp.lt.s32.totalorder %v871_v23, 1 }
  0xf5   : > { %vm893_vm5 = vcmp.lt.s32.totalorder %v871_v23, 4  ;;  %v221_v2 = vxor.u32 2147483648, %v220_v60  ;;  %v898_v13 = vsel %vm890_vm4, %v877_v20, %v880_v51  ;;  %v347_v3 = vshrl.u32 %v346_v43, 23 }
  0xf6   : > { %v899_v19 = vsel %vm893_vm5, %v886_v14, 920167782  ;;  %v315_v30 = vor.u32 %v314_v0, %v313_v18  ;;  %v3816_v31 = vsub.s32 %v815_v11, %v818_v47  ;;  %vm892_vm6 = vcmp.lt.s32.totalorder %v871_v23, 3 }
  0xf7   : > { %v895_v6 = vsel %vm893_vm5, %v883_v33, 2102212464  ;;  %v320_v26 = vand.u32 2147483647, %v319_v37  ;;  %vm891_vm7 = vcmp.lt.s32.totalorder %v871_v23, 2  ;;  %v900_v22 = vsel %vm892_vm6, %v883_v33, %v899_v19 }
  0xf8   : > { %v902_v25 = vsel %vm890_vm4, %v880_v51, %v883_v33  ;;  %v821_v63 = vsub.s32 0, %v3816_v31  ;;  %v894_v12 = vsel %vm890_vm4, %v874_v9, %v877_v20  ;;  %v901_v38 = vsel %vm891_vm7, %v898_v13, %v900_v22 }
  0xf9   : > { %v903_v32 = vsel %vm893_vm5, %v889_v4, 1326507024  ;;  %v896_v45 = vsel %vm892_vm6, %v880_v51, %v895_v6  ;;  %v3822_v43 = vmul.u32.u64.low %v906_v1, %v901_v38  ;;  %v3823_v59 = vmul.u32.u64.high %v906_v1, %v901_v38, %v3822_v43 }
  0xfa   : > { %v904_v49 = vsel %vm892_vm6, %v886_v14, %v903_v32  ;;  %v731_v11 = vor.u32 4788187, %v730_v27  ;;  %v322_v0 = vcvt.s32.f32 %v315_v30  ;;  %v2768_v33 = vadd.s32 4294967169, %v347_v3 }
  0xfb   : > { %v905_v18 = vsel %vm891_vm7, %v902_v25, %v904_v49  ;;  %v222_v20 = vsel %vm139_vm3, %v221_v2, %v220_v60  ;;  %v2785_v37 = vmin.u32 %v821_v63, %v3816_v31  ;;  %v897_v14 = vsel %vm891_vm7, %v894_v12, %v896_v45 }
  0xfc   : > { %v3832_v9 = vmul.u32.u64.low %v906_v1, %v905_v18  ;;  %v3833_v47 = vmul.u32.u64.high %v906_v1, %v905_v18, %v3832_v9  ;;  %v323_v51 = vmul.f32 %v322_v0, %v320_v26  ;;  %v343_v4 = vand.u32 2147483647, %v3787_v7 }
  0xfd   : > { %v353_v13 = vadd.s32 1, %v2768_v33  ;;  %v727_v41 = vor.u32 %v3781_v55, %v725_v44  ;;  %vm3843_vm8 = vcmp.le.f32.partialorder %v137_v40, 0.7853982  ;;  %v916_v60 = vadd.s32 1, %v3823_v59 }
  0xfe   : > { %v449_v2 = vand.u32 2139095040, %v3793_v35  ;;  %v3853_v23 = vmul.f32 %v631_v8, %v629_v36  ;;  %v732_v19 = vand.u32 2147483647, %v731_v11  ;;  %v3858_v29 = vsel %vm3843_vm8, %v3516_v17, %v222_v20 }
  0xff   : > { %vm354_vm9 = vcmp.gt.s32.totalorder %v353_v13, 0  ;;  %v823_v40 = vclz %v2785_v37  ;;  %v913_v56 = vmul.u32 %v906_v1, %v897_v14  ;;  %vm915_vm10 = vc.u32 %v3833_v47, %v3822_v43 }
 0x100   : > { %v355_v44 = vsel %vm354_vm9, %v353_v13, 0  ;;  %v324_v55 = vxor.u32 2147483648, %v323_v51  ;;  %v917_v28 = vsel %vm915_vm10, %v916_v60, %v3823_v59  ;;  %v350_v39 = vand.u32 8388607, %v343_v4 }
 0x101   : > { %v357_v8 = vand.u32 31, %v355_v44  ;;  %v734_v36 = vcvt.s32.f32 %v727_v41  ;;  %v918_v3 = vadd.s32 %v917_v28, %v913_v56  ;;  %v450_v30 = vshrl.u32 %v449_v2, 23 }
 0x102   : > { %v633_v6 = vxor.u32 2147483648, %v3853_v23  ;;  %v635_v26 = vsub.s32 4, %v3607_v21  ;;  %vm242_vm11 = vcmp.lt.s32.totalorder %v3528_v34, 0  ;;  %3326 = vsinq.f32 %v3858_v29 }
 0x103   : > { %v358_v1 = vsub.s32 32, %v357_v8  ;;  %v3868_v22 = vmul.f32 %v734_v36, %v732_v19  ;;  %v2786_v25 = vadd.s32 4294967294, %v823_v40  ;;  %v919_v63 = vadd.s32 536870912, %v918_v3 }
 0x104   : > { %v325_v12 = vsel %vm242_vm11, %v324_v55, %v323_v51  ;;  %v351_v38 = vor.u32 8388608, %v350_v39  ;;  %v446_v45 = vand.u32 2147483647, %v3793_v35  ;;  %v2772_v0 = vadd.s32 4294967169, %v450_v30 }
 0x105   : > { %v361_v32 = vshrl.u32 %v3448_v48, %v358_v1  ;;  %v3875_v49 = vshrl.u32 %v919_v63, 30  ;;  %v364_v59 = vshrl.u32 %v3449_v50, %v358_v1  ;;  %v367_v11 = vshrl.u32 %v3450_v52, %v358_v1 }
 0x106   : > { %v360_v18 = vshll.u32 %v3447_v46, %v357_v8  ;;  %v363_v33 = vshll.u32 %v3448_v48, %v357_v8  ;;  %v369_v20 = vshll.u32 %v3450_v52, %v357_v8  ;;  %v370_v37 = vshrl.u32 %v3451_v54, %v358_v1 }
 0x107   : > { %vm2787_vm12 = vcmp.lt.s32.totalorder %v2786_v25, 0  ;;  %v921_v9 = vshll.u32 %v3875_v49, 30  ;;  %v356_v51 = vshrl.u32 %v355_v44, 5  ;;  %v366_v14 = vshll.u32 %v3449_v50, %v357_v8 }
 0x108   : > { %v4620_v13 = vand.u32 2147483647, %v3528_v34  ;;  %v362_v60 = vor.u32 %v361_v32, %v360_v18  ;;  %v365_v2 = vor.u32 %v364_v59, %v363_v33  ;;  %v371_v19 = vor.u32 %v370_v37, %v369_v20 }
 0x109   : > { %v3891_v40 = vshll.u32 %v351_v38, 8  ;;  %vm551_vm14 = vcmp.lt.s32.totalorder %v3510_v15, 0  ;;  %v3894_v56 = vsub.s32 %v918_v3, %v921_v9  ;;  %v368_v55 = vor.u32 %v367_v11, %v366_v14 }
 0x10a   : > { %vm3887_vm13 = vcmp.le.f32.partialorder %v4620_v13, 0.7853982  ;;  %v372_v44 = vshll.u32 %v3451_v54, %v357_v8  ;;  %v373_v28 = vshrl.u32 %v3452_v62, %v358_v1  ;;  %v826_v39 = vsel %vm2787_vm12, 0, %v2786_v25 }
 0x10b   : > { %v359_v36 = vshrl.u32 %v3447_v46, %v358_v1  ;;  %v453_v30 = vand.u32 8388607, %v446_v45  ;;  %v456_v63 = vadd.s32 1, %v2772_v0  ;;  %v924_v32 = vsub.s32 0, %v3894_v56 }
 0x10c   : > { %v374_v38 = vor.u32 %v373_v28, %v372_v44  ;;  %vm375_vm15 = vcmp.lt.s32.totalorder %v356_v51, 1  ;;  %vm378_vm0 = vcmp.lt.s32.totalorder %v356_v51, 4  ;;  %vm376_vm1 = vcmp.lt.s32.totalorder %v356_v51, 2 }
 0x10d   : > { %vm377_vm2 = vcmp.lt.s32.totalorder %v356_v51, 3  ;;  %v383_v3 = vsel %vm375_vm15, %v362_v60, %v365_v2  ;;  %v384_v59 = vsel %vm378_vm0, %v371_v19, 920167782  ;;  %v2789_v8 = vmin.u32 %v924_v32, %v3894_v56 }
 0x10e   : > { %v380_v11 = vsel %vm378_vm0, %v368_v55, 2102212464  ;;  %v385_v25 = vsel %vm377_vm2, %v368_v55, %v384_v59  ;;  %v387_v18 = vsel %vm375_vm15, %v365_v2, %v368_v55  ;;  %v827_v1 = vsub.s32 32, %v826_v39 }
 0x10f   : > { %v831_v33 = vsub.s32 4294967266, %v826_v39  ;;  %v386_v20 = vsel %vm376_vm1, %v383_v3, %v385_v25  ;;  %v388_v0 = vsel %vm378_vm0, %v374_v38, 1326507024  ;;  %v379_v37 = vsel %vm375_vm15, %v359_v36, %v362_v60  ;;  %v3911_v44 = vpop.eup %3326 }
 0x110   : > { %v389_v9 = vsel %vm377_vm2, %v371_v19, %v388_v0  ;;  %v3907_v14 = vmul.u32.u64.low %v3891_v40, %v386_v20  ;;  %v3908_v13 = vmul.u32.u64.high %v3891_v40, %v386_v20, %v3907_v14  ;;  %v926_v28 = vclz %v2789_v8 }
 0x111   : > { %v381_v32 = vsel %vm377_vm2, %v365_v2, %v380_v11  ;;  %v390_v55 = vsel %vm376_vm1, %v387_v18, %v389_v9  ;;  %vm457_vm4 = vcmp.gt.s32.totalorder %v456_v63, 0  ;;  %v328_v38 = vsel %vm3887_vm13, %v3528_v34, %v325_v12 }
 0x112   : > { %v811_v60 = vadd.s32 %v3759_v58, %v3774_v42  ;;  %v3921_v19 = vmul.u32.u64.low %v3891_v40, %v390_v55  ;;  %v3922_v36 = vmul.u32.u64.high %v3891_v40, %v390_v55, %v3921_v19  ;;  %v3929_v2 = vsel %vm551_vm14, %v633_v6, %v3853_v23 }
 0x113   : > { %3328 = vcosq.f32 %v3858_v29  ;;  %v454_v3 = vor.u32 8388608, %v453_v30  ;;  %v458_v59 = vsel %vm457_vm4, %v456_v63, 0  ;;  %v832_v12 = vadd.s32 127, %v831_v33 }
 0x114   : > { %v829_v8 = vshrl.u32 %v811_v60, %v827_v1  ;;  %v382_v11 = vsel %vm376_vm1, %v379_v37, %v381_v32  ;;  %v401_v58 = vadd.s32 1, %v3908_v13  ;;  %v736_v42 = vxor.u32 2147483648, %v3868_v22 }
 0x115   : > { %3330 = vcosq.f32 %v328_v38  ;;  %v2790_v25 = vadd.s32 4294967294, %v926_v28  ;;  %v460_v18 = vand.u32 31, %v458_v59  ;;  %v828_v20 = vshll.u32 %v3816_v31, %v826_v39 }
 0x116   : > { %3332 = vsinq.f32 %v328_v38  ;;  %v223_v23 = vsub.s32 4, %v3674_v5  ;;  %v233_v29 = vxor.u32 2147483648, %v3911_v44  ;;  %v3940_v6 = vadd.s32 %v3822_v43, %v3833_v47 }
 0x117   : > { %v398_v51 = vmul.u32 %v3891_v40, %v382_v11  ;;  %vm400_vm5 = vc.u32 %v3922_v36, %v3907_v14  ;;  %v461_v30 = vsub.s32 32, %v460_v18  ;;  %v3945_v63 = vor.u32 %v829_v8, %v828_v20 }
 0x118   : > { %v833_v1 = vshll.u32 %v832_v12, 23  ;;  %v402_v33 = vsel %vm400_vm5, %v401_v58, %v3908_v13  ;;  %v3948_v31 = vshll.u32 %v454_v3, 8  ;;  %vm2791_vm6 = vcmp.lt.s32.totalorder %v2790_v25, 0 }
 0x119   : > { %v403_v39 = vadd.s32 %v402_v33, %v398_v51  ;;  %v464_v0 = vshrl.u32 %v3448_v48, %v461_v30  ;;  %v467_v43 = vshrl.u32 %v3449_v50, %v461_v30  ;;  %v463_v47 = vshll.u32 %v3447_v46, %v460_v18 }
 0x11a   : > { %v466_v40 = vshll.u32 %v3448_v48, %v460_v18  ;;  %v469_v37 = vshll.u32 %v3449_v50, %v460_v18  ;;  %v470_v9 = vshrl.u32 %v3450_v52, %v461_v30  ;;  %v459_v32 = vshrl.u32 %v458_v59, 5 }
 0x11b   : > { %v404_v28 = vadd.s32 536870912, %v403_v39  ;;  %v472_v13 = vshll.u32 %v3450_v52, %v460_v18  ;;  %v473_v55 = vshrl.u32 %v3451_v54, %v461_v30  ;;  %v3958_v38 = vor.u32 4788187, %v833_v1 }
 0x11c   : > { %v465_v60 = vor.u32 %v464_v0, %v463_v47  ;;  %v468_v19 = vor.u32 %v467_v43, %v466_v40  ;;  %v471_v3 = vor.u32 %v470_v9, %v469_v37  ;;  %v475_v48 = vshll.u32 %v3451_v54, %v460_v18 }
 0x11d   : > { %v3960_v8 = vshrl.u32 %v404_v28, 30  ;;  %v474_v12 = vor.u32 %v473_v55, %v472_v13  ;;  %v476_v50 = vshrl.u32 %v3452_v62, %v461_v30  ;;  %v3965_v11 = vsel %vm2791_vm6, 0, %v2790_v25 }
 0x11e   : > { %v462_v59 = vshrl.u32 %v3447_v46, %v461_v30  ;;  %v224_v52 = vsel %vm139_vm3, %v223_v23, %v3674_v5  ;;  %v326_v58 = vsub.s32 4, %v3728_v57  ;;  %vm478_vm7 = vcmp.lt.s32.totalorder %v459_v32, 1 }
 0x11f   : > { %v406_v20 = vshll.u32 %v3960_v8, 30  ;;  %v477_v51 = vor.u32 %v476_v50, %v475_v48  ;;  %vm481_vm9 = vcmp.lt.s32.totalorder %v459_v32, 4  ;;  %vm480_vm10 = vcmp.lt.s32.totalorder %v459_v32, 3 }
 0x120   : > { %v3973_v1 = vpop.eup %3328  ;;  %v483_v54 = vsel %vm481_vm9, %v471_v3, 2102212464  ;;  %v486_v62 = vsel %vm478_vm7, %v465_v60, %v468_v19  ;;  %v487_v46 = vsel %vm481_vm9, %v474_v12, 920167782  ;;  %v934_v25 = vsub.s32 4294967266, %v3965_v11 }
 0x121   : > { %v3979_v18 = vsub.s32 %v403_v39, %v406_v20  ;;  %vm479_vm3 = vcmp.lt.s32.totalorder %v459_v32, 2  ;;  %v488_v5 = vsel %vm480_vm10, %v471_v3, %v487_v46  ;;  %v837_v30 = vcvt.s32.f32 %v3945_v63 }
 0x122   : > { %v3982_v23 = vpop.eup %3330  ;;  %v482_v33 = vsel %vm478_vm7, %v462_v59, %v465_v60  ;;  %v489_v0 = vsel %vm479_vm3, %v486_v62, %v488_v5  ;;  %v226_v43 = vsel %vm3843_vm8, 0, %v224_v52  ;;  %v484_v39 = vsel %vm480_vm10, %v468_v19, %v483_v54 }
 0x123   : > { %v3989_v47 = vpop.eup %3332  ;;  %v409_v40 = vsub.s32 0, %v3979_v18  ;;  %v490_v37 = vsel %vm478_vm7, %v468_v19, %v471_v3  ;;  %v491_v9 = vsel %vm481_vm9, %v477_v51, 1326507024  ;;  %v930_v28 = vsub.s32 32, %v3965_v11 }
 0x124   : > { %v492_v13 = vsel %vm480_vm10, %v474_v12, %v491_v9  ;;  %v3998_v55 = vmul.u32.u64.low %v3948_v31, %v489_v0  ;;  %v3999_v60 = vmul.u32.u64.high %v3948_v31, %v489_v0, %v3998_v55  ;;  %v4002_v27 = vadd.s32 127, %v934_v25 }
 0x125   : > { %v2769_v48 = vmin.u32 %v409_v40, %v3979_v18  ;;  %v493_v50 = vsel %vm479_vm3, %v490_v37, %v492_v13  ;;  %v327_v19 = vsel %vm242_vm11, %v326_v58, %v3728_v57  ;;  %v485_v3 = vsel %vm479_vm3, %v482_v33, %v484_v39 }
 0x126   : > { %v4011_v59 = vmul.u32.u64.low %v3948_v31, %v493_v50  ;;  %v4012_v12 = vmul.u32.u64.high %v3948_v31, %v493_v50, %v4011_v59  ;;  %v329_v52 = vsel %vm3887_vm13, 0, %v327_v19  ;;  %v931_v20 = vshll.u32 %v3894_v56, %v3965_v11 }
 0x127   : > { %v399_v51 = vadd.s32 %v3907_v14, %v3922_v36  ;;  %v411_v54 = vclz %v2769_v48  ;;  %v236_v62 = vxor.u32 2147483648, %v3973_v1  ;;  %v932_v57 = vshrl.u32 %v3940_v6, %v930_v28 }
 0x128   : > { %v504_v32 = vadd.s32 1, %v3999_v60  ;;  %vm229_vm8 = vweird.f32 %v3516_v17  ;;  %v1054_v58 = vadd.s32 3, %v226_v43  ;;  %v1158_v46 = vadd.s32 3, %v329_v52 }
 0x129   : > { %v936_v41 = vshll.u32 %v4002_v27, 23  ;;  %v2770_v25 = vadd.s32 4294967294, %v411_v54  ;;  %v501_v5 = vmul.u32 %v3948_v31, %v485_v3  ;;  %v230_v56 = vand.u32 3, %v226_v43 }
 0x12a   : > { %vm503_vm11 = vc.u32 %v4012_v12, %v3998_v55  ;;  %vm332_vm12 = vweird.f32 %v3528_v34  ;;  %v336_v14 = vxor.u32 2147483648, %v3989_v47  ;;  %v1055_v36 = vand.u32 3, %v1054_v58 }
 0x12b   : > { %v1159_v6 = vand.u32 3, %v1158_v46  ;;  %vm2771_vm13 = vcmp.lt.s32.totalorder %v2770_v25, 0  ;;  %v505_v11 = vsel %vm503_vm11, %v504_v32, %v3999_v60  ;;  %v339_v33 = vxor.u32 2147483648, %v3982_v23 }
 0x12c   : > { %v333_v0 = vand.u32 3, %v329_v52  ;;  %v414_v40 = vsel %vm2771_vm13, 0, %v2770_v25  ;;  %v506_v39 = vadd.s32 %v505_v11, %v501_v5  ;;  %vm1057_vm15 = vcmp.eq.s32.totalorder %v1055_v36, 0 }
 0x12d   : > { %vm232_vm0 = vcmp.eq.s32.totalorder %v230_v56, 0  ;;  %v415_v31 = vsub.s32 32, %v414_v40  ;;  %v419_v43 = vsub.s32 4294967266, %v414_v40  ;;  %vm1056_vm1 = vcmp.lt.s32.totalorder %v1055_v36, 2 }
 0x12e   : > { %v1059_v37 = vsel %vm1057_vm15, %v3973_v1, %v233_v29  ;;  %v416_v9 = vshll.u32 %v3979_v18, %v414_v40  ;;  %v507_v28 = vadd.s32 536870912, %v506_v39  ;;  %vm1060_vm2 = vcmp.eq.s32.totalorder %v1055_v36, 2 }
 0x12f   : > { %vm1161_vm4 = vcmp.eq.s32.totalorder %v1159_v6, 0  ;;  %v4623_v13 = vand.u32 2147483647, %v3510_v15  ;;  %vm654_vm6 = vcmp.lt.s32.totalorder %v3513_v16, 0  ;;  %v417_v27 = vshrl.u32 %v399_v51, %v415_v31 }
 0x130   : > { %v420_v48 = vadd.s32 127, %v419_v43  ;;  %v1062_v50 = vsel %vm1060_vm2, %v236_v62, %v3911_v44  ;;  %v1163_v19 = vsel %vm1161_vm4, %v3982_v23, %v336_v14  ;;  %v4045_v3 = vshrl.u32 %v507_v28, 30 }
 0x131   : > { %vm4038_vm5 = vcmp.le.f32.partialorder %v4623_v13, 0.7853982  ;;  %v1063_v18 = vsel %vm1056_vm1, %v1059_v37, %v1062_v50  ;;  %vm1160_vm7 = vcmp.lt.s32.totalorder %v1159_v6, 2  ;;  %vm1164_vm9 = vcmp.eq.s32.totalorder %v1159_v6, 2 }
 0x132   : > { %v418_v59 = vor.u32 %v417_v27, %v416_v9  ;;  %v421_v52 = vshll.u32 %v420_v48, 23  ;;  %v1064_v54 = vsel %vm229_vm8, nan, %v1063_v18  ;;  %v1166_v32 = vsel %vm1164_vm9, %v339_v33, %v3989_v47 }
 0x133   : > { %v509_v58 = vshll.u32 %v4045_v3, 30  ;;  %v1167_v51 = vsel %vm1160_vm7, %v1163_v19, %v1166_v32  ;;  %v234_v46 = vsel %vm232_vm0, %v3973_v1, %v233_v29  ;;  %vm235_vm10 = vcmp.eq.s32.totalorder %v230_v56, 2 }
 0x134   : > { %v835_v25 = vand.u32 2147483647, %v3958_v38  ;;  %v422_v5 = vor.u32 4788187, %v421_v52  ;;  %v1168_v36 = vsel %vm332_vm12, nan, %v1167_v51  ;;  %v237_v6 = vsel %vm235_vm10, %v236_v62, %v3911_v44 }
 0x135   : > { %v933_v11 = vor.u32 %v932_v57, %v931_v20  ;;  %v4059_v40 = vsub.s32 %v506_v39, %v509_v58  ;;  %v4061_v31 = vpack.i.bf16 %v1168_v36, %v1064_v54  ;;  %vm231_vm3 = vcmp.lt.s32.totalorder %v230_v56, 2 }
 0x136   : > { %v937_v43 = vor.u32 4788187, %v936_v41  ;;  %v423_v37 = vand.u32 2147483647, %v422_v5  ;;  %v425_v9 = vcvt.s32.f32 %v418_v59  ;;  %v238_v28 = vsel %vm231_vm3, %v234_v46, %v237_v6 }
 0x137   : > { %v512_v29 = vsub.s32 0, %v4059_v40  ;;  %3231 = vxpose.xlu1.b32.start [1/8] (short) %v4061_v31, 128  ;;  %vm334_vm11 = vcmp.lt.s32.totalorder %v333_v0, 2  ;;  %vm335_vm13 = vcmp.eq.s32.totalorder %v333_v0, 0  ;;  %vm338_vm15 = vcmp.eq.s32.totalorder %v333_v0, 2 }
 0x138   : > { %v426_v38 = vmul.f32 %v425_v9, %v423_v37  ;;  %v239_v44 = vsel %vm229_vm8, nan, %v238_v28  ;;  %v337_v1 = vsel %vm335_vm13, %v3982_v23, %v336_v14  ;;  %v340_v20 = vsel %vm338_vm15, %v339_v33, %v3989_v47 }
 0x139   : > { %v637_v62 = vsel %vm4038_vm5, %v3510_v15, %v3929_v2  ;;  %v737_v57 = vsel %vm654_vm6, %v736_v42, %v3868_v22  ;;  %v2773_v41 = vmin.u32 %v512_v29, %v4059_v40  ;;  %v341_v56 = vsel %vm334_vm11, %v337_v1, %v340_v20 }
 0x13a   : > { %v838_v17 = vmul.f32 %v837_v30, %v835_v25  ;;  %v938_v23 = vand.u32 2147483647, %v937_v43  ;;  %v427_v14 = vxor.u32 2147483648, %v426_v38  ;;  %v342_v47 = vsel %vm332_vm12, nan, %v341_v56 }
 0x13b   : > { %v4626_v33 = vand.u32 2147483647, %v3513_v16  ;;  %vm345_vm0 = vcmp.lt.s32.totalorder %v3787_v7, 0  ;;  %v514_v22 = vclz %v2773_v41  ;;  %v4090_v42 = vpack.i.bf16 %v342_v47, %v239_v44 }
 0x13c   : > { %v940_v30 = vcvt.s32.f32 %v933_v11  ;;  %v428_v34 = vsel %vm345_vm0, %v427_v14, %v426_v38  ;;  %v636_v0 = vsel %vm551_vm14, %v635_v26, %v3607_v21  ;;  %3334 = vcosq.f32 %v637_v62 }
 0x13d   : > { %vm4085_vm8 = vcmp.le.f32.partialorder %v4626_v33, 0.7853982  ;;  %v429_v39 = vsub.s32 4, %v3960_v8  ;;  %v2774_v13 = vadd.s32 4294967294, %v514_v22  ;;  %3135 = vxpose.xlu0.b32.start [1/8] (short) %v4090_v42, 128  ;;  %3336 = vsinq.f32 %v637_v62 }
 0x13e   : > { %v740_v63 = vsel %vm4085_vm8, %v3513_v16, %v737_v57  ;;  %v839_v27 = vxor.u32 2147483648, %v838_v17  ;;  %v941_v48 = vmul.f32 %v940_v30, %v938_v23  ;;  %vm4106_vm12 = vcmp.le.f32.partialorder %v343_v4, 0.7853982 }
 0x13f   : > { %v738_v19 = vsub.s32 4, %v3633_v61  ;;  %3338 = vcosq.f32 %v740_v63  ;;  %v431_v21 = vsel %vm4106_vm12, %v3787_v7, %v428_v34  ;;  %vm2775_vm14 = vcmp.lt.s32.totalorder %v2774_v13, 0 }
 0x140   : > { %3340 = vsinq.f32 %v740_v63  ;;  %vm757_vm1 = vcmp.lt.s32.totalorder %v3681_v24, 0  ;;  %v517_v26 = vsel %vm2775_vm14, 0, %v2774_v13  ;;  %v532_v18 = vsub.s32 4, %v4045_v3 }
 0x141   : > { %v430_v4 = vsel %vm345_vm0, %v429_v39, %v3960_v8  ;;  %v502_v59 = vadd.s32 %v3998_v55, %v4012_v12  ;;  %v518_v52 = vsub.s32 32, %v517_v26  ;;  %v522_v54 = vsub.s32 4294967266, %v517_v26 }
 0x142   : > { %v840_v32 = vsel %vm757_vm1, %v839_v27, %v838_v17  ;;  %v942_v58 = vxor.u32 2147483648, %v941_v48  ;;  %3342 = vcosq.f32 %v431_v21  ;;  %vm448_vm2 = vcmp.lt.s32.totalorder %v3793_v35, 0 }
 0x143   : > { %3344 = vsinq.f32 %v431_v21  ;;  %v519_v51 = vshll.u32 %v4059_v40, %v517_v26  ;;  %v520_v46 = vshrl.u32 %v502_v59, %v518_v52  ;;  %v523_v25 = vadd.s32 127, %v522_v54 }
 0x144   : > { %v739_v8 = vsel %vm654_vm6, %v738_v19, %v3633_v61  ;;  %v841_v55 = vsub.s32 4, %v3809_v10  ;;  %v432_v12 = vsel %vm4106_vm12, 0, %v430_v4  ;;  %v533_v5 = vsel %vm448_vm2, %v532_v18, %v4045_v3 }
 0x145   : > { %v4631_v36 = vand.u32 2147483647, %v3681_v24  ;;  %vm860_vm7 = vcmp.lt.s32.totalorder %v3715_v53, 0  ;;  %v521_v11 = vor.u32 %v520_v46, %v519_v51  ;;  %v524_v40 = vshll.u32 %v523_v25, 23 }
 0x146   : > { %v943_v43 = vsel %vm860_vm7, %v942_v58, %v941_v48  ;;  %v944_v37 = vsub.s32 4, %v3875_v49  ;;  %vm4149_vm6 = vcmp.le.f32.partialorder %v446_v45, 0.7853982  ;;  %v638_v9 = vsel %vm4038_vm5, 0, %v636_v0 }
 0x147   : > { %vm4136_vm4 = vcmp.le.f32.partialorder %v4631_v36, 0.7853982  ;;  %v525_v28 = vor.u32 4788187, %v524_v40  ;;  %v535_v29 = vsel %vm4149_vm6, 0, %v533_v5  ;;  %v1262_v38 = vadd.s32 3, %v432_v12 }
 0x148   : > { %v843_v61 = vsel %vm4136_vm4, %v3681_v24, %v840_v32  ;;  %v741_v44 = vsel %vm4085_vm8, 0, %v739_v8  ;;  %v842_v1 = vsel %vm757_vm1, %v841_v55, %v3809_v10  ;;  %v4636_v45 = vand.u32 2147483647, %v3715_v53 }
 0x149   : > { %3346 = vcosq.f32 %v843_v61  ;;  %v526_v62 = vand.u32 2147483647, %v525_v28  ;;  %v528_v57 = vcvt.s32.f32 %v521_v11  ;;  %v3335_v41 = vpop.eup %3334  ;;  %v945_v56 = vsel %vm860_vm7, %v944_v37, %v3875_v49 }
 0x14a   : > { %vm4164_vm9 = vcmp.le.f32.partialorder %v4636_v45, 0.7853982  ;;  %3348 = vsinq.f32 %v843_v61  ;;  %v1366_v10 = vadd.s32 3, %v535_v29  ;;  %v1470_v17 = vadd.s32 3, %v638_v9  ;;  %v3337_v23 = vpop.eup %3336 }
 0x14b   : > { %v946_v60 = vsel %vm4164_vm9, %v3715_v53, %v943_v43  ;;  %v529_v14 = vmul.f32 %v528_v57, %v526_v62  ;;  %v4174_v47 = vand.u32 3, %v1262_v38  ;;  %v4176_v33 = vand.u32 3, %v432_v12 }
 0x14c   : > { %v1574_v2 = vadd.s32 3, %v741_v44  ;;  %v4178_v22 = vpop.eup %3338  ;;  %3350 = vcosq.f32 %v946_v60  ;;  %v4184_v30 = vsel %vm4136_vm4, 0, %v842_v1  ;;  %v4188_v34 = vsel %vm4164_vm9, 0, %v945_v56 }
 0x14d   : > { %v4180_v63 = vpop.eup %3340  ;;  %3352 = vsinq.f32 %v946_v60  ;;  %v530_v49 = vxor.u32 2147483648, %v529_v14  ;;  %v4190_v0 = vand.u32 3, %v1366_v10  ;;  %v4192_v39 = vand.u32 3, %v535_v29 }
 0x14e   : > { %v1471_v13 = vand.u32 3, %v1470_v17  ;;  %vm1265_vm5 = vcmp.eq.s32.totalorder %v4174_v47, 0  ;;  %vm438_vm10 = vcmp.eq.s32.totalorder %v4176_v33, 0  ;;  %v645_v50 = vxor.u32 2147483648, %v3337_v23 }
 0x14f   : > { %v3343_v27 = vpop.eup %3342  ;;  %v531_v48 = vsel %vm448_vm2, %v530_v49, %v529_v14  ;;  %v1575_v19 = vand.u32 3, %v1574_v2  ;;  %v648_v18 = vxor.u32 2147483648, %v3335_v41  ;;  %v748_v4 = vxor.u32 2147483648, %v4180_v63 }
 0x150   : > { %v3345_v21 = vpop.eup %3344  ;;  %v534_v26 = vsel %vm4149_vm6, %v3793_v35, %v531_v48  ;;  %v751_v59 = vxor.u32 2147483648, %v4178_v22  ;;  %vm1264_vm3 = vcmp.lt.s32.totalorder %v4174_v47, 2  ;;  %vm1268_vm11 = vcmp.eq.s32.totalorder %v4174_v47, 2 }
 0x151   : > { %3354 = vcosq.f32 %v534_v26  ;;  %vm441_vm13 = vcmp.eq.s32.totalorder %v4176_v33, 2  ;;  %v642_v52 = vand.u32 3, %v638_v9  ;;  %vm437_vm15 = vcmp.lt.s32.totalorder %v4176_v33, 2 }
 0x152   : > { %3356 = vsinq.f32 %v534_v26  ;;  %vm1473_vm0 = vcmp.eq.s32.totalorder %v1471_v13, 0  ;;  %vm1476_vm12 = vcmp.eq.s32.totalorder %v1471_v13, 2  ;;  %v745_v54 = vand.u32 3, %v741_v44 }
 0x153   : > { %v439_v32 = vxor.u32 2147483648, %v3345_v21  ;;  %v442_v58 = vxor.u32 2147483648, %v3343_v27  ;;  %vm1577_vm14 = vcmp.eq.s32.totalorder %v1575_v19, 0  ;;  %vm1580_vm1 = vcmp.eq.s32.totalorder %v1575_v19, 2 }
 0x154   : > { %vm435_vm2 = vweird.f32 %v3787_v7  ;;  %v1475_v51 = vsel %vm1473_vm0, %v3335_v41, %v645_v50  ;;  %v1478_v46 = vsel %vm1476_vm12, %v648_v18, %v3337_v23  ;;  %v1579_v25 = vsel %vm1577_vm14, %v4178_v22, %v748_v4 }
 0x155   : > { %v1582_v8 = vsel %vm1580_vm1, %v751_v59, %v4180_v63  ;;  %vm1472_vm4 = vcmp.lt.s32.totalorder %v1471_v13, 2  ;;  %vm643_vm7 = vcmp.lt.s32.totalorder %v642_v52, 2  ;;  %vm644_vm6 = vcmp.eq.s32.totalorder %v642_v52, 0 }
 0x156   : > { %vm647_vm9 = vcmp.eq.s32.totalorder %v642_v52, 2  ;;  %v4211_v55 = vpop.eup %3346  ;;  %vm1576_vm8 = vcmp.lt.s32.totalorder %v1575_v19, 2  ;;  %v646_v12 = vsel %vm644_vm6, %v3335_v41, %v645_v50  ;;  %v1678_v36 = vadd.s32 3, %v4184_v30 }
 0x157   : > { %v649_v5 = vsel %vm647_vm9, %v648_v18, %v3337_v23  ;;  %v3349_v6 = vpop.eup %3348  ;;  %v1267_v11 = vsel %vm1265_vm5, %v3343_v27, %v439_v32  ;;  %v1270_v40 = vsel %vm1268_vm11, %v442_v58, %v3345_v21  ;;  %v1479_v61 = vsel %vm1472_vm4, %v1475_v51, %v1478_v46 }
 0x158   : > { %v1583_v43 = vsel %vm1576_vm8, %v1579_v25, %v1582_v8  ;;  %vm1372_vm0 = vcmp.eq.s32.totalorder %v4190_v0, 2  ;;  %v440_v37 = vsel %vm438_vm10, %v3343_v27, %v439_v32  ;;  %v443_v3 = vsel %vm441_vm13, %v442_v58, %v3345_v21 }
 0x159   : > { %vm544_vm12 = vcmp.eq.s32.totalorder %v4192_v39, 2  ;;  %vm747_vm14 = vcmp.eq.s32.totalorder %v745_v54, 0  ;;  %v1782_v9 = vadd.s32 3, %v4188_v34  ;;  %v3351_v28 = vpop.eup %3350  ;;  %vm1369_vm5 = vcmp.eq.s32.totalorder %v4190_v0, 0 }
 0x15a   : > { %vm541_vm11 = vcmp.eq.s32.totalorder %v4192_v39, 0  ;;  %vm744_vm8 = vweird.f32 %v3513_v16  ;;  %v650_v29 = vsel %vm643_vm7, %v646_v12, %v649_v5  ;;  %v749_v38 = vsel %vm747_vm14, %v4178_v22, %v748_v4  ;;  %v3353_v44 = vpop.eup %3352 }
 0x15b   : > { %vm750_vm10 = vcmp.eq.s32.totalorder %v745_v54, 2  ;;  %v1271_v1 = vsel %vm1264_vm3, %v1267_v11, %v1270_v40  ;;  %vm1368_vm13 = vcmp.lt.s32.totalorder %v4190_v0, 2  ;;  %vm540_vm1 = vcmp.lt.s32.totalorder %v4192_v39, 2 }
 0x15c   : > { %v752_v45 = vsel %vm750_vm10, %v751_v59, %v4180_v63  ;;  %v1679_v20 = vand.u32 3, %v1678_v36  ;;  %v848_v60 = vand.u32 3, %v4184_v30  ;;  %vm538_vm4 = vweird.f32 %v3793_v35 }
 0x15d   : > { %v444_v62 = vsel %vm437_vm15, %v440_v37, %v443_v3  ;;  %vm4639_vm7 = vweird.f32 %v3510_v15  ;;  %v1584_v41 = vsel %vm744_vm8, nan, %v1583_v43  ;;  %v851_v56 = vxor.u32 2147483648, %v3349_v6 }
 0x15e   : > { %v1480_v57 = vsel %vm4639_vm7, nan, %v1479_v61  ;;  %vm4640_vm3 = vmmov %vm4639_vm7  ;;  %vm746_vm6 = vcmp.lt.s32.totalorder %v745_v54, 2  ;;  %v854_v17 = vxor.u32 2147483648, %v4211_v55  ;;  %v1783_v23 = vand.u32 3, %v1782_v9  ;;  %v3355_v22 = vpop.eup %3354 }
 0x15f   : > { %v651_v10 = vsel %vm4640_vm3, nan, %v650_v29  ;;  %v1272_v14 = vsel %vm435_vm2, nan, %v1271_v1  ;;  %v753_v47 = vsel %vm746_vm6, %v749_v38, %v752_v45  ;;  %v954_v33 = vxor.u32 2147483648, %v3353_v44  ;;  %v3357_v15 = vpop.eup %3356 }
 0x160   : > { %v957_v2 = vxor.u32 2147483648, %v3351_v28  ;;  %v445_v63 = vsel %vm435_vm2, nan, %v444_v62  ;;  %vm1681_vm15 = vcmp.eq.s32.totalorder %v1679_v20, 0  ;;  %vm850_vm9 = vcmp.eq.s32.totalorder %v848_v60, 0 }
 0x161   : > { %v951_v30 = vand.u32 3, %v4188_v34  ;;  %v545_v49 = vxor.u32 2147483648, %v3355_v22  ;;  %v1683_v13 = vsel %vm1681_vm15, %v4211_v55, %v851_v56  ;;  %vm1684_vm14 = vcmp.eq.s32.totalorder %v1679_v20, 2 }
 0x162   : > { %vm853_vm10 = vcmp.eq.s32.totalorder %v848_v60, 2  ;;  %v542_v27 = vxor.u32 2147483648, %v3357_v15  ;;  %v1686_v48 = vsel %vm1684_vm14, %v854_v17, %v3349_v6  ;;  %vm1785_vm7 = vcmp.eq.s32.totalorder %v1783_v23, 0 }
 0x163   : > { %vm1788_vm3 = vcmp.eq.s32.totalorder %v1783_v23, 2  ;;  %v1374_v50 = vsel %vm1372_vm0, %v545_v49, %v3357_v15  ;;  %v546_v7 = vsel %vm544_vm12, %v545_v49, %v3357_v15  ;;  %v1787_v19 = vsel %vm1785_vm7, %v3351_v28, %v954_v33 }
 0x164   : > { %v1790_v21 = vsel %vm1788_vm3, %v957_v2, %v3353_v44  ;;  %v1371_v34 = vsel %vm1369_vm5, %v3355_v22, %v542_v27  ;;  %v543_v26 = vsel %vm541_vm11, %v3355_v22, %v542_v27  ;;  %v852_v18 = vsel %vm850_vm9, %v4211_v55, %v851_v56 }
 0x165   : > { %v855_v4 = vsel %vm853_vm10, %v854_v17, %v3349_v6  ;;  %v1375_v59 = vsel %vm1368_vm13, %v1371_v34, %v1374_v50  ;;  %v547_v52 = vsel %vm540_vm1, %v543_v26, %v546_v7  ;;  %vm953_vm2 = vcmp.eq.s32.totalorder %v951_v30, 0 }
 0x166   : > { %vm956_vm0 = vcmp.eq.s32.totalorder %v951_v30, 2  ;;  %v1376_v54 = vsel %vm538_vm4, nan, %v1375_v59  ;;  %v548_v32 = vsel %vm538_vm4, nan, %v547_v52  ;;  %v955_v58 = vsel %vm953_vm2, %v3351_v28, %v954_v33 }
 0x167   : > { %v958_v51 = vsel %vm956_vm0, %v957_v2, %v3353_v44  ;;  %v3232_v46 = vpack.i.bf16 %v1376_v54, %v1272_v14  ;;  %v3136_v25 = vpack.i.bf16 %v548_v32, %v445_v63  ;;  %v754_v8 = vsel %vm744_vm8, nan, %v753_v47 }
 0x168   : > { %vm1680_vm12 = vcmp.lt.s32.totalorder %v1679_v20, 2  ;;  %vm1784_vm5 = vcmp.lt.s32.totalorder %v1783_v23, 2  ;;  %vm849_vm11 = vcmp.lt.s32.totalorder %v848_v60, 2  ;;  %vm952_vm13 = vcmp.lt.s32.totalorder %v951_v30, 2 }
 0x169   : > { %v1687_v0 = vsel %vm1680_vm12, %v1683_v13, %v1686_v48  ;;  %3233 = vxpose.xlu1.b32.cont [2/8] (short) %v3232_v46, 128  ;;  %3137 = vxpose.xlu0.b32.cont [2/8] (short) %v3136_v25, 128  ;;  %v1791_v39 = vsel %vm1784_vm5, %v1787_v19, %v1790_v21  ;;  %v856_v55 = vsel %vm849_vm11, %v852_v18, %v855_v4  ;;  %vm847_vm1 = vweird.f32 %v3681_v24 }
 0x16a   : > { %v959_v12 = vsel %vm952_vm13, %v955_v58, %v958_v51  ;;  %v3234_v5 = vpack.i.bf16 %v1584_v41, %v1480_v57  ;;  %v3138_v35 = vpack.i.bf16 %v754_v8, %v651_v10  ;;  %vm950_vm4 = vweird.f32 %v3715_v53 }
 0x16b   : > { %v1688_v36 = vsel %vm847_vm1, nan, %v1687_v0  ;;  %v1792_v6 = vsel %vm950_vm4, nan, %v1791_v39  ;;  %v857_v16 = vsel %vm847_vm1, nan, %v856_v55  ;;  %v960_v11 = vsel %vm950_vm4, nan, %v959_v12 }
 0x16c   : > { %v3236_v40 = vpack.i.bf16 %v1792_v6, %v1688_v36  ;;  %v3140_v61 = vpack.i.bf16 %v960_v11, %v857_v16  ;;  %vm1985_vm8 = vcmask 519168  }
 0x16d   : > { %3235 = vxpose.xlu1.b32.cont [3/8] (short) %v3234_v5, 128  ;;  %3139 = vxpose.xlu0.b32.cont [3/8] (short) %v3138_v35, 128 }
 0x171   : > { %3237 = vxpose.xlu1.b32.cont [4/8] (short) %v3236_v40, 128  ;;  %3141 = vxpose.xlu0.b32.cont [4/8] (short) %v3140_v61, 128 }
 0x175   : > { %3239 = vxpose.xlu1.b32.cont [5/8] (short) %v4061_v31, 128  ;;  %3143 = vxpose.xlu0.b32.cont [5/8] (short) %v4090_v42, 128 }
 0x179   : > { %3241 = vxpose.xlu1.b32.cont [6/8] (short) %v3232_v46, 128  ;;  %3145 = vxpose.xlu0.b32.cont [6/8] (short) %v3136_v25, 128 }
 0x17d   : > { %3243 = vxpose.xlu1.b32.cont [7/8] (short) %v3234_v5, 128  ;;  %3147 = vxpose.xlu0.b32.cont [7/8] (short) %v3138_v35, 128 }
 0x181   : > { %3245 = vxpose.xlu1.b32.end [8/8] (short) %v3236_v40, 128  ;;  %3149 = vxpose.xlu0.b32.end [8/8] (short) %v3140_v61, 128 }
 0x1e1   : > { %v3246_v24 = vpop.trf.xlu1  ;;  %v3150_v53 = vpop.trf.xlu0 }
 0x1e2   : > { %v3250_v43 = vunpack.i.h.bf16 %v3246_v24  ;;  %v3247_v37 = vunpack.i.l.bf16 %v3246_v24  ;;  %v3154_v3 = vunpack.i.h.bf16 %v3150_v53  ;;  %v3151_v9 = vunpack.i.l.bf16 %v3150_v53 }
 0x1e4   : > { %v2985_v28 = vpack.c.bf16 %v3250_v43, %v3250_v43  ;;  %v2969_v29 = vpack.c.bf16 %v3247_v37, %v3247_v37  ;;  %v2953_v31 = vpack.c.bf16 %v3154_v3, %v3154_v3  ;;  %v2937_v38 = vpack.c.bf16 %v3151_v9, %v3151_v9 }
 0x1e5   : > { %v3251_v42 = vpop.trf.xlu1  ;;  %v3155_v44 = vpop.trf.xlu0 }
 0x1e6   : > { %2888 = vst.msk [vmem:[%s4277_s26 + $0x80] sm:$0xf] %vm1985_vm8, %v2969_v29  ;;  %2904 = vst.msk [vmem:[%s4277_s26 + $0xc0] sm:$0xf] %vm1985_vm8, %v2985_v28  ;;  %v3255_v1 = vunpack.i.h.bf16 %v3251_v42  ;;  %v3252_v45 = vunpack.i.l.bf16 %v3251_v42  ;;  %v3159_v20 = vunpack.i.h.bf16 %v3155_v44  ;;  %v3156_v60 = vunpack.i.l.bf16 %v3155_v44 }
 0x1e7   : > { %1986 = vst.msk [vmem:[%s4277_s26] sm:$0xf] %vm1985_vm8, %v2937_v38  ;;  %2002 = vst.msk [vmem:[%s4277_s26 + $0x40] sm:$0xf] %vm1985_vm8, %v2953_v31 }
 0x1e8   : > { %v2986_v62 = vpack.c.bf16 %v3255_v1, %v3255_v1  ;;  %v2970_v57 = vpack.c.bf16 %v3252_v45, %v3252_v45  ;;  %v2954_v41 = vpack.c.bf16 %v3159_v20, %v3159_v20  ;;  %v2938_v56 = vpack.c.bf16 %v3156_v60, %v3156_v60 }
 0x1e9   : > { %v3256_v10 = vpop.trf.xlu1  ;;  %v3160_v17 = vpop.trf.xlu0 }
 0x1ea   : > { %2889 = vst.msk [vmem:[%s4277_s26 + $0x84] sm:$0xf] %vm1985_vm8, %v2970_v57  ;;  %2905 = vst.msk [vmem:[%s4277_s26 + $0xc4] sm:$0xf] %vm1985_vm8, %v2986_v62  ;;  %v3260_v23 = vunpack.i.h.bf16 %v3256_v10  ;;  %v3257_v14 = vunpack.i.l.bf16 %v3256_v10  ;;  %v3164_v47 = vunpack.i.h.bf16 %v3160_v17  ;;  %v3161_v33 = vunpack.i.l.bf16 %v3160_v17 }
 0x1eb   : > { %1987 = vst.msk [vmem:[%s4277_s26 + $0x4] sm:$0xf] %vm1985_vm8, %v2938_v56  ;;  %2003 = vst.msk [vmem:[%s4277_s26 + $0x44] sm:$0xf] %vm1985_vm8, %v2954_v41 }
 0x1ec   : > { %v2987_v2 = vpack.c.bf16 %v3260_v23, %v3260_v23  ;;  %v2971_v22 = vpack.c.bf16 %v3257_v14, %v3257_v14  ;;  %v2955_v63 = vpack.c.bf16 %v3164_v47, %v3164_v47  ;;  %v2939_v30 = vpack.c.bf16 %v3161_v33, %v3161_v33 }
 0x1ed   : > { %v3261_v15 = vpop.trf.xlu1  ;;  %v3165_v49 = vpop.trf.xlu0 }
 0x1ee   : > { %2890 = vst.msk [vmem:[%s4277_s26 + $0x88] sm:$0xf] %vm1985_vm8, %v2971_v22  ;;  %2906 = vst.msk [vmem:[%s4277_s26 + $0xc8] sm:$0xf] %vm1985_vm8, %v2987_v2  ;;  %v3265_v13 = vunpack.i.h.bf16 %v3261_v15  ;;  %v3262_v27 = vunpack.i.l.bf16 %v3261_v15  ;;  %v3169_v48 = vunpack.i.h.bf16 %v3165_v49  ;;  %v3166_v50 = vunpack.i.l.bf16 %v3165_v49 }
 0x1ef   : > { %1988 = vst.msk [vmem:[%s4277_s26 + $0x8] sm:$0xf] %vm1985_vm8, %v2939_v30  ;;  %2004 = vst.msk [vmem:[%s4277_s26 + $0x48] sm:$0xf] %vm1985_vm8, %v2955_v63 }
 0x1f0   : > { %v2988_v7 = vpack.c.bf16 %v3265_v13, %v3265_v13  ;;  %v2972_v19 = vpack.c.bf16 %v3262_v27, %v3262_v27  ;;  %v2956_v21 = vpack.c.bf16 %v3169_v48, %v3169_v48  ;;  %v2940_v34 = vpack.c.bf16 %v3166_v50, %v3166_v50 }
 0x1f1   : > { %v3266_v26 = vpop.trf.xlu1  ;;  %v3170_v18 = vpop.trf.xlu0 }
 0x1f2   : > { %2891 = vst.msk [vmem:[%s4277_s26 + $0x8c] sm:$0xf] %vm1985_vm8, %v2972_v19  ;;  %2907 = vst.msk [vmem:[%s4277_s26 + $0xcc] sm:$0xf] %vm1985_vm8, %v2988_v7  ;;  %v3270_v4 = vunpack.i.h.bf16 %v3266_v26  ;;  %v3267_v59 = vunpack.i.l.bf16 %v3266_v26  ;;  %v3174_v52 = vunpack.i.h.bf16 %v3170_v18  ;;  %v3171_v54 = vunpack.i.l.bf16 %v3170_v18 }
 0x1f3   : > { %1989 = vst.msk [vmem:[%s4277_s26 + $0xc] sm:$0xf] %vm1985_vm8, %v2940_v34  ;;  %2005 = vst.msk [vmem:[%s4277_s26 + $0x4c] sm:$0xf] %vm1985_vm8, %v2956_v21 }
 0x1f4   : > { %v2989_v32 = vpack.c.bf16 %v3270_v4, %v3270_v4  ;;  %v2973_v58 = vpack.c.bf16 %v3267_v59, %v3267_v59  ;;  %v2957_v51 = vpack.c.bf16 %v3174_v52, %v3174_v52  ;;  %v2941_v46 = vpack.c.bf16 %v3171_v54, %v3171_v54 }
 0x1f5   : > { %v3271_v25 = vpop.trf.xlu1  ;;  %v3175_v8 = vpop.trf.xlu0 }
 0x1f6   : > { %2892 = vst.msk [vmem:[%s4277_s26 + $0x90] sm:$0xf] %vm1985_vm8, %v2973_v58  ;;  %2908 = vst.msk [vmem:[%s4277_s26 + $0xd0] sm:$0xf] %vm1985_vm8, %v2989_v32  ;;  %v3275_v0 = vunpack.i.h.bf16 %v3271_v25  ;;  %v3272_v39 = vunpack.i.l.bf16 %v3271_v25  ;;  %v3179_v55 = vunpack.i.h.bf16 %v3175_v8  ;;  %v3176_v12 = vunpack.i.l.bf16 %v3175_v8 }
 0x1f7   : > { %1990 = vst.msk [vmem:[%s4277_s26 + $0x10] sm:$0xf] %vm1985_vm8, %v2941_v46  ;;  %2006 = vst.msk [vmem:[%s4277_s26 + $0x50] sm:$0xf] %vm1985_vm8, %v2957_v51 }
 0x1f8   : > { %v2990_v5 = vpack.c.bf16 %v3275_v0, %v3275_v0  ;;  %v2974_v35 = vpack.c.bf16 %v3272_v39, %v3272_v39  ;;  %v2958_v36 = vpack.c.bf16 %v3179_v55, %v3179_v55  ;;  %v2942_v6 = vpack.c.bf16 %v3176_v12, %v3176_v12 }
 0x1f9   : > { %v3276_v16 = vpop.trf.xlu1  ;;  %v3180_v11 = vpop.trf.xlu0 }
 0x1fa   : > { %2893 = vst.msk [vmem:[%s4277_s26 + $0x94] sm:$0xf] %vm1985_vm8, %v2974_v35  ;;  %2909 = vst.msk [vmem:[%s4277_s26 + $0xd4] sm:$0xf] %vm1985_vm8, %v2990_v5  ;;  %v3280_v40 = vunpack.i.h.bf16 %v3276_v16  ;;  %v3277_v61 = vunpack.i.l.bf16 %v3276_v16  ;;  %v3184_v24 = vunpack.i.h.bf16 %v3180_v11  ;;  %v3181_v53 = vunpack.i.l.bf16 %v3180_v11 }
 0x1fb   : > { %1991 = vst.msk [vmem:[%s4277_s26 + $0x14] sm:$0xf] %vm1985_vm8, %v2942_v6  ;;  %2007 = vst.msk [vmem:[%s4277_s26 + $0x54] sm:$0xf] %vm1985_vm8, %v2958_v36 }
 0x1fc   : > { %v2991_v43 = vpack.c.bf16 %v3280_v40, %v3280_v40  ;;  %v2975_v37 = vpack.c.bf16 %v3277_v61, %v3277_v61  ;;  %v2959_v3 = vpack.c.bf16 %v3184_v24, %v3184_v24  ;;  %v2943_v9 = vpack.c.bf16 %v3181_v53, %v3181_v53 }
 0x1fd   : > { %v3281_v28 = vpop.trf.xlu1  ;;  %v3185_v29 = vpop.trf.xlu0 }
 0x1fe   : > { %2894 = vst.msk [vmem:[%s4277_s26 + $0x98] sm:$0xf] %vm1985_vm8, %v2975_v37  ;;  %2910 = vst.msk [vmem:[%s4277_s26 + $0xd8] sm:$0xf] %vm1985_vm8, %v2991_v43  ;;  %v3285_v31 = vunpack.i.h.bf16 %v3281_v28  ;;  %v3282_v38 = vunpack.i.l.bf16 %v3281_v28  ;;  %v3189_v42 = vunpack.i.h.bf16 %v3185_v29  ;;  %v3186_v44 = vunpack.i.l.bf16 %v3185_v29 }
 0x1ff   : > { %1992 = vst.msk [vmem:[%s4277_s26 + $0x18] sm:$0xf] %vm1985_vm8, %v2943_v9  ;;  %2008 = vst.msk [vmem:[%s4277_s26 + $0x58] sm:$0xf] %vm1985_vm8, %v2959_v3 }
 0x200   : > { %v2992_v1 = vpack.c.bf16 %v3285_v31, %v3285_v31  ;;  %v2976_v45 = vpack.c.bf16 %v3282_v38, %v3282_v38  ;;  %v2960_v20 = vpack.c.bf16 %v3189_v42, %v3189_v42  ;;  %v2944_v60 = vpack.c.bf16 %v3186_v44, %v3186_v44 }
 0x201   : > { %v3286_v62 = vpop.trf.xlu1  ;;  %v3190_v57 = vpop.trf.xlu0 }
 0x202   : > { %2895 = vst.msk [vmem:[%s4277_s26 + $0x9c] sm:$0xf] %vm1985_vm8, %v2976_v45  ;;  %2911 = vst.msk [vmem:[%s4277_s26 + $0xdc] sm:$0xf] %vm1985_vm8, %v2992_v1  ;;  %v3290_v41 = vunpack.i.h.bf16 %v3286_v62  ;;  %v3287_v56 = vunpack.i.l.bf16 %v3286_v62  ;;  %v3194_v10 = vunpack.i.h.bf16 %v3190_v57  ;;  %v3191_v17 = vunpack.i.l.bf16 %v3190_v57 }
 0x203   : > { %1993 = vst.msk [vmem:[%s4277_s26 + $0x1c] sm:$0xf] %vm1985_vm8, %v2944_v60  ;;  %2009 = vst.msk [vmem:[%s4277_s26 + $0x5c] sm:$0xf] %vm1985_vm8, %v2960_v20 }
 0x204   : > { %v2993_v23 = vpack.c.bf16 %v3290_v41, %v3290_v41  ;;  %v2977_v14 = vpack.c.bf16 %v3287_v56, %v3287_v56  ;;  %v2961_v47 = vpack.c.bf16 %v3194_v10, %v3194_v10  ;;  %v2945_v33 = vpack.c.bf16 %v3191_v17, %v3191_v17 }
 0x205   : > { %v3291_v2 = vpop.trf.xlu1  ;;  %v3195_v22 = vpop.trf.xlu0 }
 0x206   : > { %2896 = vst.msk [vmem:[%s4277_s26 + $0xa0] sm:$0xf] %vm1985_vm8, %v2977_v14  ;;  %2912 = vst.msk [vmem:[%s4277_s26 + $0xe0] sm:$0xf] %vm1985_vm8, %v2993_v23  ;;  %v3295_v63 = vunpack.i.h.bf16 %v3291_v2  ;;  %v3292_v30 = vunpack.i.l.bf16 %v3291_v2  ;;  %v3199_v15 = vunpack.i.h.bf16 %v3195_v22  ;;  %v3196_v49 = vunpack.i.l.bf16 %v3195_v22 }
 0x207   : > { %1994 = vst.msk [vmem:[%s4277_s26 + $0x20] sm:$0xf] %vm1985_vm8, %v2945_v33  ;;  %2010 = vst.msk [vmem:[%s4277_s26 + $0x60] sm:$0xf] %vm1985_vm8, %v2961_v47 }
 0x208   : > { %v2994_v13 = vpack.c.bf16 %v3295_v63, %v3295_v63  ;;  %v2978_v27 = vpack.c.bf16 %v3292_v30, %v3292_v30  ;;  %v2962_v48 = vpack.c.bf16 %v3199_v15, %v3199_v15  ;;  %v2946_v50 = vpack.c.bf16 %v3196_v49, %v3196_v49 }
 0x209   : > { %v3296_v7 = vpop.trf.xlu1  ;;  %v3200_v19 = vpop.trf.xlu0 }
 0x20a   : > { %2897 = vst.msk [vmem:[%s4277_s26 + $0xa4] sm:$0xf] %vm1985_vm8, %v2978_v27  ;;  %2913 = vst.msk [vmem:[%s4277_s26 + $0xe4] sm:$0xf] %vm1985_vm8, %v2994_v13  ;;  %v3300_v21 = vunpack.i.h.bf16 %v3296_v7  ;;  %v3297_v34 = vunpack.i.l.bf16 %v3296_v7  ;;  %v3204_v26 = vunpack.i.h.bf16 %v3200_v19  ;;  %v3201_v18 = vunpack.i.l.bf16 %v3200_v19 }
 0x20b   : > { %1995 = vst.msk [vmem:[%s4277_s26 + $0x24] sm:$0xf] %vm1985_vm8, %v2946_v50  ;;  %2011 = vst.msk [vmem:[%s4277_s26 + $0x64] sm:$0xf] %vm1985_vm8, %v2962_v48 }
 0x20c   : > { %v2995_v4 = vpack.c.bf16 %v3300_v21, %v3300_v21  ;;  %v2979_v59 = vpack.c.bf16 %v3297_v34, %v3297_v34  ;;  %v2963_v52 = vpack.c.bf16 %v3204_v26, %v3204_v26  ;;  %v2947_v54 = vpack.c.bf16 %v3201_v18, %v3201_v18 }
 0x20d   : > { %v3301_v32 = vpop.trf.xlu1  ;;  %v3205_v58 = vpop.trf.xlu0 }
 0x20e   : > { %2898 = vst.msk [vmem:[%s4277_s26 + $0xa8] sm:$0xf] %vm1985_vm8, %v2979_v59  ;;  %2914 = vst.msk [vmem:[%s4277_s26 + $0xe8] sm:$0xf] %vm1985_vm8, %v2995_v4  ;;  %v3305_v51 = vunpack.i.h.bf16 %v3301_v32  ;;  %v3302_v46 = vunpack.i.l.bf16 %v3301_v32  ;;  %v3209_v25 = vunpack.i.h.bf16 %v3205_v58  ;;  %v3206_v8 = vunpack.i.l.bf16 %v3205_v58 }
 0x20f   : > { %1996 = vst.msk [vmem:[%s4277_s26 + $0x28] sm:$0xf] %vm1985_vm8, %v2947_v54  ;;  %2012 = vst.msk [vmem:[%s4277_s26 + $0x68] sm:$0xf] %vm1985_vm8, %v2963_v52 }
 0x210   : > { %v2996_v0 = vpack.c.bf16 %v3305_v51, %v3305_v51  ;;  %v2980_v39 = vpack.c.bf16 %v3302_v46, %v3302_v46  ;;  %v2964_v55 = vpack.c.bf16 %v3209_v25, %v3209_v25  ;;  %v2948_v12 = vpack.c.bf16 %v3206_v8, %v3206_v8 }
 0x211   : > { %v3306_v5 = vpop.trf.xlu1  ;;  %v3210_v35 = vpop.trf.xlu0 }
 0x212   : > { %2899 = vst.msk [vmem:[%s4277_s26 + $0xac] sm:$0xf] %vm1985_vm8, %v2980_v39  ;;  %2915 = vst.msk [vmem:[%s4277_s26 + $0xec] sm:$0xf] %vm1985_vm8, %v2996_v0  ;;  %v3310_v36 = vunpack.i.h.bf16 %v3306_v5  ;;  %v3307_v6 = vunpack.i.l.bf16 %v3306_v5  ;;  %v3214_v16 = vunpack.i.h.bf16 %v3210_v35  ;;  %v3211_v11 = vunpack.i.l.bf16 %v3210_v35 }
 0x213   : > { %1997 = vst.msk [vmem:[%s4277_s26 + $0x2c] sm:$0xf] %vm1985_vm8, %v2948_v12  ;;  %2013 = vst.msk [vmem:[%s4277_s26 + $0x6c] sm:$0xf] %vm1985_vm8, %v2964_v55 }
 0x214   : > { %v2997_v40 = vpack.c.bf16 %v3310_v36, %v3310_v36  ;;  %v2981_v61 = vpack.c.bf16 %v3307_v6, %v3307_v6  ;;  %v2965_v24 = vpack.c.bf16 %v3214_v16, %v3214_v16  ;;  %v2949_v53 = vpack.c.bf16 %v3211_v11, %v3211_v11 }
 0x215   : > { %v3311_v43 = vpop.trf.xlu1  ;;  %v3215_v37 = vpop.trf.xlu0 }
 0x216   : > { %2900 = vst.msk [vmem:[%s4277_s26 + $0xb0] sm:$0xf] %vm1985_vm8, %v2981_v61  ;;  %2916 = vst.msk [vmem:[%s4277_s26 + $0xf0] sm:$0xf] %vm1985_vm8, %v2997_v40  ;;  %v3315_v3 = vunpack.i.h.bf16 %v3311_v43  ;;  %v3312_v9 = vunpack.i.l.bf16 %v3311_v43  ;;  %v3219_v28 = vunpack.i.h.bf16 %v3215_v37  ;;  %v3216_v29 = vunpack.i.l.bf16 %v3215_v37 }
 0x217   : > { %1998 = vst.msk [vmem:[%s4277_s26 + $0x30] sm:$0xf] %vm1985_vm8, %v2949_v53  ;;  %2014 = vst.msk [vmem:[%s4277_s26 + $0x70] sm:$0xf] %vm1985_vm8, %v2965_v24 }
 0x218   : > { %v2998_v31 = vpack.c.bf16 %v3315_v3, %v3315_v3  ;;  %v2982_v38 = vpack.c.bf16 %v3312_v9, %v3312_v9  ;;  %v2966_v42 = vpack.c.bf16 %v3219_v28, %v3219_v28  ;;  %v2950_v44 = vpack.c.bf16 %v3216_v29, %v3216_v29 }
 0x219   : > { %v3316_v1 = vpop.trf.xlu1  ;;  %v3220_v45 = vpop.trf.xlu0 }
 0x21a   : > { %2901 = vst.msk [vmem:[%s4277_s26 + $0xb4] sm:$0xf] %vm1985_vm8, %v2982_v38  ;;  %2917 = vst.msk [vmem:[%s4277_s26 + $0xf4] sm:$0xf] %vm1985_vm8, %v2998_v31  ;;  %v3320_v20 = vunpack.i.h.bf16 %v3316_v1  ;;  %v3317_v60 = vunpack.i.l.bf16 %v3316_v1  ;;  %v3224_v62 = vunpack.i.h.bf16 %v3220_v45  ;;  %v3221_v57 = vunpack.i.l.bf16 %v3220_v45 }
 0x21b   : > { %1999 = vst.msk [vmem:[%s4277_s26 + $0x34] sm:$0xf] %vm1985_vm8, %v2950_v44  ;;  %2015 = vst.msk [vmem:[%s4277_s26 + $0x74] sm:$0xf] %vm1985_vm8, %v2966_v42 }
 0x21c   : > { %v2999_v41 = vpack.c.bf16 %v3320_v20, %v3320_v20  ;;  %v2983_v56 = vpack.c.bf16 %v3317_v60, %v3317_v60  ;;  %v2967_v10 = vpack.c.bf16 %v3224_v62, %v3224_v62  ;;  %v2951_v17 = vpack.c.bf16 %v3221_v57, %v3221_v57 }
 0x21d   : > { %v3321_v23 = vpop.trf.xlu1  ;;  %v3225_v14 = vpop.trf.xlu0 }
 0x21e   : > { %2902 = vst.msk [vmem:[%s4277_s26 + $0xb8] sm:$0xf] %vm1985_vm8, %v2983_v56  ;;  %2918 = vst.msk [vmem:[%s4277_s26 + $0xf8] sm:$0xf] %vm1985_vm8, %v2999_v41  ;;  %v3325_v47 = vunpack.i.h.bf16 %v3321_v23  ;;  %v3322_v33 = vunpack.i.l.bf16 %v3321_v23  ;;  %v3229_v2 = vunpack.i.h.bf16 %v3225_v14  ;;  %v3226_v22 = vunpack.i.l.bf16 %v3225_v14 }
 0x21f   : > { %2000 = vst.msk [vmem:[%s4277_s26 + $0x38] sm:$0xf] %vm1985_vm8, %v2951_v17  ;;  %2016 = vst.msk [vmem:[%s4277_s26 + $0x78] sm:$0xf] %vm1985_vm8, %v2967_v10  ;;  %2249 = sbr.rel (!%p3488_p4) target bundleno = 629 (0x275), region = 28 }
 0x220   : > { %v3000_v63 = vpack.c.bf16 %v3325_v47, %v3325_v47  ;;  %v2984_v30 = vpack.c.bf16 %v3322_v33, %v3322_v33  ;;  %v2968_v15 = vpack.c.bf16 %v3229_v2, %v3229_v2  ;;  %v2952_v49 = vpack.c.bf16 %v3226_v22, %v3226_v22 }
 0x222   : > { %2903 = vst.msk [vmem:[%s4277_s26 + $0xbc] sm:$0xf] %vm1985_vm8, %v2984_v30  ;;  %2919 = vst.msk [vmem:[%s4277_s26 + $0xfc] sm:$0xf] %vm1985_vm8, %v3000_v63 }
 0x223   : > { %2001 = vst.msk [vmem:[%s4277_s26 + $0x3c] sm:$0xf] %vm1985_vm8, %v2952_v49  ;;  %2017 = vst.msk [vmem:[%s4277_s26 + $0x7c] sm:$0xf] %vm1985_vm8, %v2968_v15 }
 0x224   : > { %s4648_s29 = smov (!%p2252_p7, %s2251_s29), 32 }
 0x225   : > { %s2922_s4 = sshll.u32 %s4648_s29, 7 }
 0x226   : > { %p2925_p8 = scmp.eq.s32.totalorder %s2922_s4, 0 }
 0x227   : > { %s4420_s5 = sshrl.u32 (!%p2925_p8), %s4648_s29, 5 }
 0x228   : > { %2260 = sbr.rel (%p2925_p8) target bundleno = 629 (0x275), region = 32  ;;  %p2926_p9 = scmp.le.s32.totalorder (!%p2925_p8), %s4420_s5, 0 }
 0x22d   : > { %2717 = sbr.rel (%p2926_p9) target bundleno = 612 (0x264), region = 122  ;;  %s4641_s6 = smov (!%p2926_p9), %s4414_s3 }
 0x22e   : > { %s4642_s8 = smov (!%p2926_p9), %s4277_s26  ;;  %s4429_s9 = smov (!%p2926_p9), 0  }
 0x22f   : > { %s4431_s11 = smov (!%p2926_p9), 0  }
 0x232 LB: >> { %v2277_v13 = vld [vmem:[%s3420_s8] sm:$0xf]  ;;  %v2279_v27 = vld [vmem:[%s3420_s8 + $0x4] sm:$0xf]  ;;  %v2281_v48 = vld [vmem:[%s3420_s8 + $0x8] sm:$0xf]  ;;  %s3428_s11 = sphi %s4431_s11, %s2271_s11   ;;  %s3424_s9 = sphi %s4429_s9, %s4643_s9   ;;  %s3420_s8 = sphi %s4642_s8, %s2410_s8   ;;  %s3416_s6 = sphi %s4641_s6, %s2411_s6  }
 0x233   : >> { %2278 = vst [vmem:[%s3416_s6] sm:$0xf] %v2277_v13  ;;  %2280 = vst [vmem:[%s3416_s6 + $0x4] sm:$0xf] %v2279_v27  ;;  %v2283_v50 = vld [vmem:[%s3420_s8 + $0xc] sm:$0xf]  ;;  %s2405_s12 = sadd.s32 1, %s3424_s9 }
 0x234   : >> { %2282 = vst [vmem:[%s3416_s6 + $0x8] sm:$0xf] %v2281_v48  ;;  %v2285_v7 = vld [vmem:[%s3420_s8 + $0x10] sm:$0xf]  ;;  %v2287_v19 = vld [vmem:[%s3420_s8 + $0x14] sm:$0xf]  ;;  %p2406_p10 = scmp.ge.s32.totalorder %s2405_s12, %s4420_s5 }
 0x235   : >> { %2284 = vst [vmem:[%s3416_s6 + $0xc] sm:$0xf] %v2283_v50  ;;  %2286 = vst [vmem:[%s3416_s6 + $0x10] sm:$0xf] %v2285_v7  ;;  %v2289_v21 = vld [vmem:[%s3420_s8 + $0x18] sm:$0xf] }
 0x236   : >> { %2288 = vst [vmem:[%s3416_s6 + $0x14] sm:$0xf] %v2287_v19  ;;  %v2291_v34 = vld [vmem:[%s3420_s8 + $0x1c] sm:$0xf]  ;;  %v2293_v26 = vld [vmem:[%s3420_s8 + $0x20] sm:$0xf] }
 0x237   : >> { %2290 = vst [vmem:[%s3416_s6 + $0x18] sm:$0xf] %v2289_v21  ;;  %2292 = vst [vmem:[%s3416_s6 + $0x1c] sm:$0xf] %v2291_v34  ;;  %v2295_v18 = vld [vmem:[%s3420_s8 + $0x24] sm:$0xf] }
 0x238   : >> { %2294 = vst [vmem:[%s3416_s6 + $0x20] sm:$0xf] %v2293_v26  ;;  %v2297_v4 = vld [vmem:[%s3420_s8 + $0x28] sm:$0xf]  ;;  %v2299_v59 = vld [vmem:[%s3420_s8 + $0x2c] sm:$0xf] }
 0x239   : >> { %2296 = vst [vmem:[%s3416_s6 + $0x24] sm:$0xf] %v2295_v18  ;;  %2298 = vst [vmem:[%s3416_s6 + $0x28] sm:$0xf] %v2297_v4  ;;  %v2301_v52 = vld [vmem:[%s3420_s8 + $0x30] sm:$0xf] }
 0x23a   : >> { %2300 = vst [vmem:[%s3416_s6 + $0x2c] sm:$0xf] %v2299_v59  ;;  %v2303_v54 = vld [vmem:[%s3420_s8 + $0x34] sm:$0xf]  ;;  %v2305_v32 = vld [vmem:[%s3420_s8 + $0x38] sm:$0xf] }
 0x23b   : >> { %2302 = vst [vmem:[%s3416_s6 + $0x30] sm:$0xf] %v2301_v52  ;;  %2304 = vst [vmem:[%s3416_s6 + $0x34] sm:$0xf] %v2303_v54  ;;  %v2307_v58 = vld [vmem:[%s3420_s8 + $0x3c] sm:$0xf] }
 0x23c   : >> { %2306 = vst [vmem:[%s3416_s6 + $0x38] sm:$0xf] %v2305_v32  ;;  %v2309_v51 = vld [vmem:[%s3420_s8 + $0x40] sm:$0xf]  ;;  %v2311_v46 = vld [vmem:[%s3420_s8 + $0x44] sm:$0xf] }
 0x23d   : >> { %2308 = vst [vmem:[%s3416_s6 + $0x3c] sm:$0xf] %v2307_v58  ;;  %2310 = vst [vmem:[%s3416_s6 + $0x40] sm:$0xf] %v2309_v51  ;;  %v2313_v25 = vld [vmem:[%s3420_s8 + $0x48] sm:$0xf] }
 0x23e   : >> { %2312 = vst [vmem:[%s3416_s6 + $0x44] sm:$0xf] %v2311_v46  ;;  %v2315_v8 = vld [vmem:[%s3420_s8 + $0x4c] sm:$0xf]  ;;  %v2317_v0 = vld [vmem:[%s3420_s8 + $0x50] sm:$0xf] }
 0x23f   : >> { %2314 = vst [vmem:[%s3416_s6 + $0x48] sm:$0xf] %v2313_v25  ;;  %2316 = vst [vmem:[%s3416_s6 + $0x4c] sm:$0xf] %v2315_v8  ;;  %v2319_v39 = vld [vmem:[%s3420_s8 + $0x54] sm:$0xf] }
 0x240   : >> { %2318 = vst [vmem:[%s3416_s6 + $0x50] sm:$0xf] %v2317_v0  ;;  %v2321_v55 = vld [vmem:[%s3420_s8 + $0x58] sm:$0xf]  ;;  %v2323_v12 = vld [vmem:[%s3420_s8 + $0x5c] sm:$0xf] }
 0x241   : >> { %2320 = vst [vmem:[%s3416_s6 + $0x54] sm:$0xf] %v2319_v39  ;;  %2322 = vst [vmem:[%s3416_s6 + $0x58] sm:$0xf] %v2321_v55  ;;  %v2325_v5 = vld [vmem:[%s3420_s8 + $0x60] sm:$0xf] }
 0x242   : >> { %2324 = vst [vmem:[%s3416_s6 + $0x5c] sm:$0xf] %v2323_v12  ;;  %v2327_v35 = vld [vmem:[%s3420_s8 + $0x64] sm:$0xf]  ;;  %v2329_v36 = vld [vmem:[%s3420_s8 + $0x68] sm:$0xf] }
 0x243   : >> { %2326 = vst [vmem:[%s3416_s6 + $0x60] sm:$0xf] %v2325_v5  ;;  %2328 = vst [vmem:[%s3416_s6 + $0x64] sm:$0xf] %v2327_v35  ;;  %v2331_v6 = vld [vmem:[%s3420_s8 + $0x6c] sm:$0xf] }
 0x244   : >> { %2330 = vst [vmem:[%s3416_s6 + $0x68] sm:$0xf] %v2329_v36  ;;  %v2333_v16 = vld [vmem:[%s3420_s8 + $0x70] sm:$0xf]  ;;  %v2335_v11 = vld [vmem:[%s3420_s8 + $0x74] sm:$0xf] }
 0x245   : >> { %2332 = vst [vmem:[%s3416_s6 + $0x6c] sm:$0xf] %v2331_v6  ;;  %2334 = vst [vmem:[%s3416_s6 + $0x70] sm:$0xf] %v2333_v16  ;;  %v2337_v40 = vld [vmem:[%s3420_s8 + $0x78] sm:$0xf] }
 0x246   : >> { %2336 = vst [vmem:[%s3416_s6 + $0x74] sm:$0xf] %v2335_v11  ;;  %v2339_v61 = vld [vmem:[%s3420_s8 + $0x7c] sm:$0xf]  ;;  %v2341_v24 = vld [vmem:[%s3420_s8 + $0x80] sm:$0xf] }
 0x247   : >> { %2338 = vst [vmem:[%s3416_s6 + $0x78] sm:$0xf] %v2337_v40  ;;  %2340 = vst [vmem:[%s3416_s6 + $0x7c] sm:$0xf] %v2339_v61  ;;  %v2343_v53 = vld [vmem:[%s3420_s8 + $0x84] sm:$0xf] }
 0x248   : >> { %2342 = vst [vmem:[%s3416_s6 + $0x98] sm:$0xf] %v2341_v24  ;;  %v2345_v43 = vld [vmem:[%s3420_s8 + $0x88] sm:$0xf]  ;;  %v2347_v37 = vld [vmem:[%s3420_s8 + $0x8c] sm:$0xf] }
 0x249   : >> { %2344 = vst [vmem:[%s3416_s6 + $0x9c] sm:$0xf] %v2343_v53  ;;  %2346 = vst [vmem:[%s3416_s6 + $0xa0] sm:$0xf] %v2345_v43  ;;  %v2349_v3 = vld [vmem:[%s3420_s8 + $0x90] sm:$0xf] }
 0x24a   : >> { %2348 = vst [vmem:[%s3416_s6 + $0xa4] sm:$0xf] %v2347_v37  ;;  %v2351_v9 = vld [vmem:[%s3420_s8 + $0x94] sm:$0xf]  ;;  %v2353_v28 = vld [vmem:[%s3420_s8 + $0x98] sm:$0xf] }
 0x24b   : >> { %2350 = vst [vmem:[%s3416_s6 + $0xa8] sm:$0xf] %v2349_v3  ;;  %2352 = vst [vmem:[%s3416_s6 + $0xac] sm:$0xf] %v2351_v9  ;;  %v2355_v29 = vld [vmem:[%s3420_s8 + $0x9c] sm:$0xf] }
 0x24c   : >> { %2354 = vst [vmem:[%s3416_s6 + $0xb0] sm:$0xf] %v2353_v28  ;;  %v2357_v31 = vld [vmem:[%s3420_s8 + $0xa0] sm:$0xf]  ;;  %v2359_v38 = vld [vmem:[%s3420_s8 + $0xa4] sm:$0xf] }
 0x24d   : >> { %2356 = vst [vmem:[%s3416_s6 + $0xb4] sm:$0xf] %v2355_v29  ;;  %2358 = vst [vmem:[%s3416_s6 + $0xb8] sm:$0xf] %v2357_v31  ;;  %v2361_v42 = vld [vmem:[%s3420_s8 + $0xa8] sm:$0xf] }
 0x24e   : >> { %2360 = vst [vmem:[%s3416_s6 + $0xbc] sm:$0xf] %v2359_v38  ;;  %v2363_v44 = vld [vmem:[%s3420_s8 + $0xac] sm:$0xf]  ;;  %v2365_v1 = vld [vmem:[%s3420_s8 + $0xb0] sm:$0xf] }
 0x24f   : >> { %2362 = vst [vmem:[%s3416_s6 + $0xc0] sm:$0xf] %v2361_v42  ;;  %2364 = vst [vmem:[%s3416_s6 + $0xc4] sm:$0xf] %v2363_v44  ;;  %v2367_v45 = vld [vmem:[%s3420_s8 + $0xb4] sm:$0xf] }
 0x250   : >> { %2366 = vst [vmem:[%s3416_s6 + $0xc8] sm:$0xf] %v2365_v1  ;;  %v2369_v20 = vld [vmem:[%s3420_s8 + $0xb8] sm:$0xf]  ;;  %v2371_v60 = vld [vmem:[%s3420_s8 + $0xbc] sm:$0xf] }
 0x251   : >> { %2368 = vst [vmem:[%s3416_s6 + $0xcc] sm:$0xf] %v2367_v45  ;;  %2370 = vst [vmem:[%s3416_s6 + $0xd0] sm:$0xf] %v2369_v20  ;;  %v2373_v62 = vld [vmem:[%s3420_s8 + $0xc0] sm:$0xf] }
 0x252   : >> { %2372 = vst [vmem:[%s3416_s6 + $0xd4] sm:$0xf] %v2371_v60  ;;  %v2375_v57 = vld [vmem:[%s3420_s8 + $0xc4] sm:$0xf]  ;;  %v2377_v41 = vld [vmem:[%s3420_s8 + $0xc8] sm:$0xf] }
 0x253   : >> { %2374 = vst [vmem:[%s3416_s6 + $0xd8] sm:$0xf] %v2373_v62  ;;  %2376 = vst [vmem:[%s3416_s6 + $0xdc] sm:$0xf] %v2375_v57  ;;  %v2379_v56 = vld [vmem:[%s3420_s8 + $0xcc] sm:$0xf] }
 0x254   : >> { %2378 = vst [vmem:[%s3416_s6 + $0xe0] sm:$0xf] %v2377_v41  ;;  %v2381_v10 = vld [vmem:[%s3420_s8 + $0xd0] sm:$0xf]  ;;  %v2383_v17 = vld [vmem:[%s3420_s8 + $0xd4] sm:$0xf] }
 0x255   : >> { %2380 = vst [vmem:[%s3416_s6 + $0xe4] sm:$0xf] %v2379_v56  ;;  %2382 = vst [vmem:[%s3416_s6 + $0xe8] sm:$0xf] %v2381_v10  ;;  %v2385_v23 = vld [vmem:[%s3420_s8 + $0xd8] sm:$0xf] }
 0x256   : >> { %2384 = vst [vmem:[%s3416_s6 + $0xec] sm:$0xf] %v2383_v17  ;;  %v2387_v14 = vld [vmem:[%s3420_s8 + $0xdc] sm:$0xf]  ;;  %v2389_v47 = vld [vmem:[%s3420_s8 + $0xe0] sm:$0xf] }
 0x257   : >> { %2386 = vst [vmem:[%s3416_s6 + $0xf0] sm:$0xf] %v2385_v23  ;;  %2388 = vst [vmem:[%s3416_s6 + $0xf4] sm:$0xf] %v2387_v14  ;;  %v2391_v33 = vld [vmem:[%s3420_s8 + $0xe4] sm:$0xf] }
 0x258   : >> { %2390 = vst [vmem:[%s3416_s6 + $0xf8] sm:$0xf] %v2389_v47  ;;  %v2393_v2 = vld [vmem:[%s3420_s8 + $0xe8] sm:$0xf]  ;;  %v2395_v22 = vld [vmem:[%s3420_s8 + $0xec] sm:$0xf] }
 0x259   : >> { %2392 = vst [vmem:[%s3416_s6 + $0xfc] sm:$0xf] %v2391_v33  ;;  %2394 = vst [vmem:[%s3416_s6 + $0x100] sm:$0xf] %v2393_v2  ;;  %v2397_v63 = vld [vmem:[%s3420_s8 + $0xf0] sm:$0xf] }
 0x25a   : >> { %2396 = vst [vmem:[%s3416_s6 + $0x104] sm:$0xf] %v2395_v22  ;;  %v2399_v30 = vld [vmem:[%s3420_s8 + $0xf4] sm:$0xf]  ;;  %v2401_v15 = vld [vmem:[%s3420_s8 + $0xf8] sm:$0xf] }
 0x25b   : >> { %2398 = vst [vmem:[%s3416_s6 + $0x108] sm:$0xf] %v2397_v63  ;;  %2400 = vst [vmem:[%s3416_s6 + $0x10c] sm:$0xf] %v2399_v30  ;;  %v2403_v49 = vld [vmem:[%s3420_s8 + $0xfc] sm:$0xf] }
 0x25c   : >> { %2402 = vst [vmem:[%s3416_s6 + $0x110] sm:$0xf] %v2401_v15  ;;  %2404 = vst [vmem:[%s3416_s6 + $0x114] sm:$0xf] %v2403_v49  ;;  %s4650_s12 = smov (%p2406_p10, %s2405_s12), 0  ;;  %s2271_s11 = sadd.s32 1, %s3428_s11  }
 0x25d   : >> { %s2927_s14 = sshll.u32 %s4650_s12, 7  ;;  %p2270_p11 = scmp.ge.s32.totalorder %s2271_s11, %s4420_s5 }
 0x25e   : >> { %s2410_s8 = scalar_lea.vmem %s4277_s26, %s2927_s14 [#allocation2]   ;;  %s2411_s6 = scalar_lea.vmem %s4414_s3, %s2927_s14  }
 0x25f   : >> { %s4643_s9 = smov %s4650_s12  ;;  %2273 = sbr.rel (!%p2270_p11) target bundleno = 562 (0x232), region = 128 }
 0x264 PF: > { %s4588_s15 = sand.u32 31, %s4648_s29   ;;  %s3002_s16 = sshll.u32 %s4420_s5, 7 }
 0x265   : > { %s4592_s17 = scalar_lea.vmem %s4277_s26, %s3002_s16 [#allocation2]   ;;  %s2418_s18 = scalar_lea.vmem %s4414_s3, %s3002_s16  }
 0x266   : > { %p2932_p12 = scmp.le.s32.totalorder %s4588_s15, 0 }
 0x267   : > { %s3430_s19 = smov (!%p2932_p12), %s2418_s18   ;;  %s3434_s20 = smov (!%p2932_p12), %s4592_s17  }
 0x268   : > { %2731 = sbr.rel (%p2932_p12) target bundleno = 629 (0x275), region = 133  ;;  %s3438_s21 = smov (!%p2932_p12), 0  }
 0x269   : > { %s3442_s22 = smov (!%p2932_p12), 0  }
 0x26d LB: >> { %v2428_v13 = vld [vmem:[%s3436_s20] sm:$0xf]  ;;  %s2432_s23 = sadd.s32 1, %s3440_s21  ;;  %s2422_s22 = sadd.s32 1, %s3444_s22   ;;  %s3444_s22 = sphi %s3442_s22, %s2422_s22   ;;  %s3440_s21 = sphi %s3438_s21, %s3439_s21   ;;  %s3436_s20 = sphi %s3434_s20, %s2437_s20   ;;  %s3432_s19 = sphi %s3430_s19, %s2438_s19  }
 0x26e   : >> { %v2430_v27 = vld [vmem:[%s3436_s20 + $0x80] sm:$0xf]  ;;  %2429 = vst [vmem:[%s3432_s19] sm:$0xf] %v2428_v13  ;;  %p2433_p13 = scmp.ge.s32.totalorder %s2432_s23, %s4588_s15  ;;  %p2421_p0 = scmp.ge.s32.totalorder %s2422_s22, %s4588_s15 }
 0x26f   : >> { %2431 = vst [vmem:[%s3432_s19 + $0x98] sm:$0xf] %v2430_v27 }
 0x270   : >> { %s4652_s23 = smov (%p2433_p13, %s2432_s23), 0  ;;  %2424 = sbr.rel (!%p2421_p0) target bundleno = 621 (0x26d), region = 139 }
 0x271   : >> { %s2933_s24 = sshll.u32 %s4652_s23, 2  ;;  %s3439_s21 = smov %s4652_s23  }
 0x272   : >> { %s2437_s20 = scalar_lea.vmem %s4592_s17, %s2933_s24 [#allocation2]   ;;  %s2438_s19 = scalar_lea.vmem %s2418_s18, %s2933_s24  }
 0x275 PF: > { %p8_p1 = scmp.ge.s32.totalorder %s3478_s10, 4   ;;  %s4644_s6 = smov %s3408_s7 }
 0x276   : > { %s4645_s7 = smov %s3486_s13  ;;  %s4646_s8 = smov %s3478_s10 }
 0x277   :  { %10 = sbr.rel (!%p8_p1) target bundleno = 2 (0x2), region = 150 }

</bundles_post_ra>
